<compile_context>
chip_gen: v7x
topology: tpu7x:2x2x1
jax: 0.10.0
libtpu: 0.0.40
codegen_flags: <defaults>
</compile_context>

<pallas_src>
import functools

import jax
import jax.numpy as jnp
from jax.experimental import pallas as pl
from jax.experimental.pallas import tpu as pltpu


def _round_up(x: int, m: int) -> int:
    return ((x + m - 1) // m) * m


def _choose_tiling(n: int):
    """Return (padded sequence length, query tile size).

    Small sequences are only 8-aligned (single tile == full padded length).
    Larger sequences are padded to a multiple of 128 so score/context vregs are
    (8,128)-aligned; the query tile is capped at 256 (fills the 256-wide MXU M
    dimension on v6e/v7x, two MXU passes on v5e's 128-wide MXU).
    """
    if n <= 64 or n % 128 == 0:
        n_pad = _round_up(n, 8)
    else:
        n_pad = _round_up(n, 128)
    if n_pad <= 256:
        return n_pad, n_pad
    return n_pad, (256 if n_pad % 256 == 0 else 128)


def _head_group(heads: int, dh: int) -> int:
    """Heads packed per context store so stores cover full 128-lane slabs."""
    if dh % 128 == 0:
        return 1                       # already lane-dense per head
    if 128 % dh != 0 or (heads * dh) % 128 != 0:
        return 1                       # cannot form aligned slabs; store per head
    g = 128 // dh
    return g if heads % g == 0 else 1


def _single_buffer_specs_supported() -> bool:
    """Whether this JAX build accepts pipeline_mode=pl.Buffered on BlockSpec."""
    if not hasattr(pl, "Buffered"):
        return False
    try:
        pl.BlockSpec((8, 128), lambda i: (0, 0), pipeline_mode=pl.Buffered(1))
        return True
    except TypeError:
        return False


_SINGLE_BUFFER_WEIGHTS = _single_buffer_specs_supported()


def vit_attention_kernel(x_ref, wqkv_ref, bqkv_ref, wout_ref, bout_ref, o_ref,
                         k_scr, v_scr, ctx_scr, *, heads, tq, n_valid, group,
                         approx_recip):
    D = ctx_scr.shape[1]
    dh = D // heads
    n_pad = k_scr.shape[0]
    qi = pl.program_id(1)

    # --- once per batch element (query tile 0): project K and V for the whole
    #     (padded) sequence into bf16 VMEM scratch.  Two K=D matmuls.
    @pl.when(qi == 0)
    def _():
        xb = x_ref[0]                                            # (N_pad, D) bf16
        for col, dst in ((1, k_scr), (2, v_scr)):
            w = wqkv_ref[:, col * D:(col + 1) * D]               # (D, D) bf16
            b = bqkv_ref[0:1, col * D:(col + 1) * D]             # (1, D) f32
            dst[...] = (jnp.dot(xb, w, preferred_element_type=jnp.float32)
                        + b).astype(dst.dtype)

    # --- per-tile Q projection (softmax scale already folded into W_q / b_q).
    q_start = pl.multiple_of(qi * tq, tq)
    x_tile = x_ref[0, pl.ds(q_start, tq), :]                     # (TQ, D) bf16
    q_tile = (jnp.dot(x_tile, wqkv_ref[:, 0:D],
                      preferred_element_type=jnp.float32)
              + bqkv_ref[0:1, 0:D]).astype(jnp.bfloat16)         # (TQ, D) bf16

    k_all = k_scr[...]                                           # (N_pad, D) bf16
    v_all = v_scr[...]                                           # (N_pad, D) bf16

    # Key-padding mask, only materialized when the wrapper actually padded N.
    if n_valid != n_pad:
        key_idx = jax.lax.broadcasted_iota(jnp.int32, (1, n_pad), 1)
        mask_bias = jnp.where(key_idx < n_valid, 0.0, -1e30).astype(jnp.float32)
    else:
        mask_bias = None

    # Per-head attention.  NOTE: the QK^T contraction is over dh (typically 64),
    # which under-fills the MXU depth (128 on v5e, 256 on v6e/v7x); the K=D
    # projections and K=N_pad P@V matmuls remain the dominant MXU work, so we do
    # NOT refactor the output projection into per-head K=dh accumulations.
    for g in range(heads // group):
        parts = []
        for hh in range(group):
            h = g * group + hh
            sl = slice(h * dh, (h + 1) * dh)
            s = jax.lax.dot_general(q_tile[:, sl], k_all[:, sl],
                                    (((1,), (1,)), ((), ())),
                                    preferred_element_type=jnp.float32)  # (TQ, N_pad)
            if mask_bias is not None:
                s = s + mask_bias
            s = s - jnp.max(s, axis=-1, keepdims=True)           # stable softmax (f32)
            p = jnp.exp(s)
            denom = jnp.sum(p, axis=-1, keepdims=True)
            pv = jnp.dot(p.astype(jnp.bfloat16), v_all[:, sl],
                         preferred_element_type=jnp.float32)     # (TQ, dh) f32
            # Deferred normalization on the (TQ, dh) result, not the (TQ, N) probs.
            if approx_recip:
                parts.append(pv * pl.reciprocal(denom, approx=True))
            else:
                parts.append(pv / denom)
        blk = parts[0] if group == 1 else jnp.concatenate(parts, axis=-1)
        ctx_scr[:, g * group * dh:(g + 1) * group * dh] = blk.astype(ctx_scr.dtype)

    # Output projection from the lane-dense bf16 context slab (single K=D matmul).
    out = (jnp.dot(ctx_scr[...], wout_ref[...], preferred_element_type=jnp.float32)
           + bout_ref[0:1, :])
    o_ref[0] = out.astype(o_ref.dtype)


def vit_attention(x, w_qkv, b_qkv, w_out, b_out, heads, *, approx_recip=True):
    B, N, D = x.shape
    assert D % heads == 0
    dh = D // heads
    scale = dh ** (-0.5)

    n_pad, tq = _choose_tiling(N)
    nqt = n_pad // tq
    group = _head_group(heads, dh)

    # Fold the softmax scale into the Q columns of the QKV projection.
    w_qkv_s = w_qkv.at[:, :D].multiply(scale)
    b_qkv_s = b_qkv.at[:, :D].multiply(scale)

    # Pad the token axis (padded keys are masked inside the kernel).
    x_p = x if n_pad == N else jnp.pad(x, ((0, 0), (0, n_pad - N), (0, 0)))

    # bf16 operands for the MXU; f32 accumulation & softmax happen inside the kernel.
    x_bf = x_p.astype(jnp.bfloat16)
    w_qkv_bf = w_qkv_s.astype(jnp.bfloat16)
    w_out_bf = w_out.astype(jnp.bfloat16)
    b_qkv_f = b_qkv_s.astype(jnp.float32)
    b_out_f = b_out.astype(jnp.float32)

    kernel = functools.partial(vit_attention_kernel, heads=heads, tq=tq,
                               n_valid=N, group=group, approx_recip=approx_recip)

    out_itemsize = jnp.dtype(x.dtype).itemsize
    weight_buf = 1 if _SINGLE_BUFFER_WEIGHTS else 2
    weight_bytes = (D * 3 * D + D * D) * 2 + 4 * D * 4
    need = (2 * n_pad * D * 2              # x block (bf16, double-buffered)
            + 2 * n_pad * D * 2            # K + V scratch (bf16)
            + tq * D * 2                   # context scratch (bf16)
            + 2 * tq * D * out_itemsize    # output tile (double-buffered)
            + weight_buf * weight_bytes)   # weights + biases
    vmem_limit = int(min(max(need * 1.5 + (4 << 20), 16 << 20), 128 << 20))

    flops = (2 * B * n_pad * D * 3 * D     # QKV projection
             + 4 * B * n_pad * n_pad * D   # QK^T and P@V
             + 2 * B * n_pad * D * D)      # output projection
    cost = pl.CostEstimate(
        flops=flops,
        transcendentals=B * heads * n_pad * n_pad,
        bytes_accessed=(B * n_pad * D * 2 + weight_bytes
                        + B * n_pad * D * out_itemsize))

    def wspec(shape):
        if _SINGLE_BUFFER_WEIGHTS:
            # Constant block index -> nothing to prefetch: single-buffer the weights.
            return pl.BlockSpec(shape, lambda b, t: (0, 0),
                                pipeline_mode=pl.Buffered(1))
        return pl.BlockSpec(shape, lambda b, t: (0, 0))

    out = pl.pallas_call(
        kernel,
        out_shape=jax.ShapeDtypeStruct((B, n_pad, D), x.dtype),
        grid=(B, nqt),
        in_specs=[
            # Full (padded) sequence per batch element; block index is constant over
            # the query-tile axis so it is only re-DMA'd when the batch changes.
            pl.BlockSpec((1, n_pad, D), lambda b, t: (b, 0, 0)),
            wspec((D, 3 * D)),     # W_qkv (scale folded into W_q columns)
            wspec((1, 3 * D)),     # b_qkv
            wspec((D, D)),         # W_out
            wspec((1, D)),         # b_out
        ],
        out_specs=pl.BlockSpec((1, tq, D), lambda b, t: (b, t, 0)),
        scratch_shapes=[
            pltpu.VMEM((n_pad, D), jnp.bfloat16),   # K (resident per batch element)
            pltpu.VMEM((n_pad, D), jnp.bfloat16),   # V (resident per batch element)
            pltpu.VMEM((tq, D), jnp.bfloat16),      # per-tile context slab
        ],
        compiler_params=pltpu.CompilerParams(
            dimension_semantics=("parallel", "arbitrary"),
            vmem_limit_bytes=vmem_limit),
        cost_estimate=cost,
    )(x_bf, w_qkv_bf, b_qkv_f, w_out_bf, b_out_f)

    if n_pad != N:
        out = out[:, :N, :]
    return out


def vit_attention_reference(x, w_qkv, b_qkv, w_out, b_out, heads):
    """Pure-JAX f32 reference mirroring the PyTorch forward (dropout = identity)."""
    B, N, D = x.shape
    dh = D // heads
    scale = dh ** (-0.5)
    qkv = x @ w_qkv + b_qkv[0]                                  # (B, N, 3D)
    qkv = qkv.reshape(B, N, 3, heads, dh).transpose(2, 0, 3, 1, 4)
    q, k, v = qkv[0], qkv[1], qkv[2]                            # (B, H, N, dh)
    attn = jnp.einsum('bhnd,bhmd->bhnm', q, k) * scale
    attn = jax.nn.softmax(attn, axis=-1)
    out = jnp.einsum('bhnm,bhmd->bhnd', attn, v)                # (B, H, N, dh)
    out = out.transpose(0, 2, 1, 3).reshape(B, N, D)
    return out @ w_out + b_out[0]


if __name__ == "__main__":
    heads = 8

    def run_case(B, N, D, seed):
        key = jax.random.fold_in(jax.random.PRNGKey(0), seed)
        kx, kwq, kbq, kwo, kbo = jax.random.split(key, 5)
        x = jax.random.normal(kx, (B, N, D), jnp.float32)
        # Synthetic parameters (shapes from nn.Linear(dim, dim*3) / nn.Linear(dim, dim)).
        w_qkv = jax.random.normal(kwq, (D, 3 * D), jnp.float32) * (1.0 / jnp.sqrt(D))
        b_qkv = jax.random.normal(kbq, (1, 3 * D), jnp.float32) * 0.02
        w_out = jax.random.normal(kwo, (D, D), jnp.float32) * (1.0 / jnp.sqrt(D))
        b_out = jax.random.normal(kbo, (1, D), jnp.float32) * 0.02

        out = jax.block_until_ready(
            vit_attention(x, w_qkv, b_qkv, w_out, b_out, heads))
        ref = vit_attention_reference(x, w_qkv, b_qkv, w_out, b_out, heads)
        assert out.shape == (B, N, D)
        # bf16 matmul operands + approximate reciprocal -> bf16-level tolerance.
        assert jnp.allclose(out, ref, atol=5e-2, rtol=5e-2), \
            f"kernel mismatch vs reference at shape {(B, N, D)}"

    # Primary small case (no padding needed).
    run_case(2, 8, 32, 0)
    # Ragged case: N=12 is padded to 16 and the padded keys are masked.
    run_case(2, 12, 32, 1)

    print("KERNEL_OK")
</pallas_src>

<mosaic_0001>
module attributes {stable_mosaic.version = 11 : i64} {
  func.func @vit_attention_kernel(%arg0: i32, %arg1: i32, %arg2: memref<1x8x32xbf16, #tpu.memory_space<vmem>>, %arg3: memref<32x96xbf16, #tpu.memory_space<vmem>>, %arg4: memref<1x96xf32, #tpu.memory_space<vmem>>, %arg5: memref<32x32xbf16, #tpu.memory_space<vmem>>, %arg6: memref<1x32xf32, #tpu.memory_space<vmem>>, %arg7: memref<1x8x32xf32, #tpu.memory_space<vmem>>, %arg8: memref<8x32xbf16, #tpu.memory_space<vmem>>, %arg9: memref<8x32xbf16, #tpu.memory_space<vmem>>, %arg10: memref<8x32xbf16, #tpu.memory_space<vmem>>) attributes {dimension_semantics = [#tpu.dimension_semantics<parallel>, #tpu.dimension_semantics<arbitrary>], iteration_bounds = array<i64: 2, 1>, scalar_prefetch = 0 : i64, scratch_operands = 3 : i64, tpu.core_type = #tpu.core_type<tc>, window_params = [{transform_indices = @transform_0, window_bounds = array<i64: 1, 8, 32>}, {pipeline_mode = #tpu.pipeline_mode<synchronous>, transform_indices = @transform_1, window_bounds = array<i64: 32, 96>}, {pipeline_mode = #tpu.pipeline_mode<synchronous>, transform_indices = @transform_2, window_bounds = array<i64: 1, 96>}, {pipeline_mode = #tpu.pipeline_mode<synchronous>, transform_indices = @transform_3, window_bounds = array<i64: 32, 32>}, {pipeline_mode = #tpu.pipeline_mode<synchronous>, transform_indices = @transform_4, window_bounds = array<i64: 1, 32>}, {transform_indices = @transform_5, window_bounds = array<i64: 1, 8, 32>}]} {
    %c0_i32 = arith.constant 0 : i32
    %0 = arith.cmpi eq, %arg1, %c0_i32 : i32
    %1 = arith.extui %0 : i1 to i32
    %c0_i32_0 = arith.constant 0 : i32
    %2 = arith.cmpi ne, %1, %c0_i32_0 : i32
    scf.if %2 {
      %c0_61 = arith.constant 0 : index
      %c0_62 = arith.constant 0 : index
      %c0_63 = arith.constant 0 : index
      %169 = vector.load %arg2[%c0_61, %c0_62, %c0_63] : memref<1x8x32xbf16, #tpu.memory_space<vmem>>, vector<1x8x32xbf16>
      %170 = vector.shape_cast %169 : vector<1x8x32xbf16> to vector<8x32xbf16>
      %c0_64 = arith.constant 0 : index
      %c32 = arith.constant 32 : index
      %171 = vector.load %arg3[%c0_64, %c32] : memref<32x96xbf16, #tpu.memory_space<vmem>>, vector<32x32xbf16>
      %c0_65 = arith.constant 0 : index
      %c32_66 = arith.constant 32 : index
      %172 = vector.load %arg4[%c0_65, %c32_66] : memref<1x96xf32, #tpu.memory_space<vmem>>, vector<1x32xf32>
      %cst_67 = arith.constant dense<0.000000e+00> : vector<8x32xf32>
      %173 = tpu.matmul %170, %171, %cst_67 {dimension_numbers = #tpu.dot_dimension_numbers<[1], [0], [0], [1], [0, 0, 1, 1], [], []>} : vector<8x32xbf16>, vector<32x32xbf16>, vector<8x32xf32> -> vector<8x32xf32>
      %174 = vector.broadcast %172 : vector<1x32xf32> to vector<8x32xf32>
      %175 = arith.addf %173, %174 : vector<8x32xf32>
      %176 = arith.truncf %175 : vector<8x32xf32> to vector<8x32xbf16>
      %c0_68 = arith.constant 0 : index
      %c0_69 = arith.constant 0 : index
      %177 = vector.load %arg8[%c0_68, %c0_69] : memref<8x32xbf16, #tpu.memory_space<vmem>>, vector<8x32xbf16>
      tpu.vector_store %arg8[%c0_68, %c0_69], %176 {strides = array<i32>} : memref<8x32xbf16, #tpu.memory_space<vmem>>, vector<8x32xbf16>,
      %c0_70 = arith.constant 0 : index
      %c64 = arith.constant 64 : index
      %178 = vector.load %arg3[%c0_70, %c64] : memref<32x96xbf16, #tpu.memory_space<vmem>>, vector<32x32xbf16>
      %c0_71 = arith.constant 0 : index
      %c64_72 = arith.constant 64 : index
      %179 = vector.load %arg4[%c0_71, %c64_72] : memref<1x96xf32, #tpu.memory_space<vmem>>, vector<1x32xf32>
      %cst_73 = arith.constant dense<0.000000e+00> : vector<8x32xf32>
      %180 = tpu.matmul %170, %178, %cst_73 {dimension_numbers = #tpu.dot_dimension_numbers<[1], [0], [0], [1], [0, 0, 1, 1], [], []>} : vector<8x32xbf16>, vector<32x32xbf16>, vector<8x32xf32> -> vector<8x32xf32>
      %181 = vector.broadcast %179 : vector<1x32xf32> to vector<8x32xf32>
      %182 = arith.addf %180, %181 : vector<8x32xf32>
      %183 = arith.truncf %182 : vector<8x32xf32> to vector<8x32xbf16>
      %c0_74 = arith.constant 0 : index
      %c0_75 = arith.constant 0 : index
      %184 = vector.load %arg9[%c0_74, %c0_75] : memref<8x32xbf16, #tpu.memory_space<vmem>>, vector<8x32xbf16>
      tpu.vector_store %arg9[%c0_74, %c0_75], %183 {strides = array<i32>} : memref<8x32xbf16, #tpu.memory_space<vmem>>, vector<8x32xbf16>,
    } else {
    }
    %c8_i32 = arith.constant 8 : i32
    %3 = arith.muli %arg1, %c8_i32 : i32
    %4 = tpu.assume_multiple %3, 8 : i32
    %c0 = arith.constant 0 : index
    %5 = arith.index_cast %4 : i32 to index
    %c0_1 = arith.constant 0 : index
    %6 = vector.load %arg2[%c0, %5, %c0_1] : memref<1x8x32xbf16, #tpu.memory_space<vmem>>, vector<1x8x32xbf16>
    %7 = vector.shape_cast %6 : vector<1x8x32xbf16> to vector<8x32xbf16>
    %c0_2 = arith.constant 0 : index
    %c0_3 = arith.constant 0 : index
    %8 = vector.load %arg3[%c0_2, %c0_3] : memref<32x96xbf16, #tpu.memory_space<vmem>>, vector<32x32xbf16>
    %cst = arith.constant dense<0.000000e+00> : vector<8x32xf32>
    %9 = tpu.matmul %7, %8, %cst {dimension_numbers = #tpu.dot_dimension_numbers<[1], [0], [0], [1], [0, 0, 1, 1], [], []>} : vector<8x32xbf16>, vector<32x32xbf16>, vector<8x32xf32> -> vector<8x32xf32>
    %c0_4 = arith.constant 0 : index
    %c0_5 = arith.constant 0 : index
    %10 = vector.load %arg4[%c0_4, %c0_5] : memref<1x96xf32, #tpu.memory_space<vmem>>, vector<1x32xf32>
    %11 = vector.broadcast %10 : vector<1x32xf32> to vector<8x32xf32>
    %12 = arith.addf %9, %11 : vector<8x32xf32>
    %13 = arith.truncf %12 : vector<8x32xf32> to vector<8x32xbf16>
    %c0_6 = arith.constant 0 : index
    %c0_7 = arith.constant 0 : index
    %14 = vector.load %arg8[%c0_6, %c0_7] : memref<8x32xbf16, #tpu.memory_space<vmem>>, vector<8x32xbf16>
    %c0_8 = arith.constant 0 : index
    %c0_9 = arith.constant 0 : index
    %15 = vector.load %arg9[%c0_8, %c0_9] : memref<8x32xbf16, #tpu.memory_space<vmem>>, vector<8x32xbf16>
    %16 = vector.extract_strided_slice %13 {offsets = [0, 0], sizes = [8, 4], strides = [1, 1]} : vector<8x32xbf16> to vector<8x4xbf16>
    %17 = vector.extract_strided_slice %14 {offsets = [0, 0], sizes = [8, 4], strides = [1, 1]} : vector<8x32xbf16> to vector<8x4xbf16>
    %cst_10 = arith.constant dense<0.000000e+00> : vector<8x8xf32>
    %18 = tpu.matmul %16, %17, %cst_10 {dimension_numbers = #tpu.dot_dimension_numbers<[1], [1], [0], [0], [0, 0, 1, 0], [], []>} : vector<8x4xbf16>, vector<8x4xbf16>, vector<8x8xf32> -> vector<8x8xf32>
    %cst_11 = arith.constant dense<0xFF800000> : vector<8xf32>
    %19 = vector.multi_reduction <maximumf>, %18, %cst_11 [1] : vector<8x8xf32> to vector<8xf32>
    %20 = vector.shape_cast %19 : vector<8xf32> to vector<8x1xf32>
    %21 = vector.broadcast %20 : vector<8x1xf32> to vector<8x8xf32>
    %22 = arith.subf %18, %21 : vector<8x8xf32>
    %23 = math.exp %22 : vector<8x8xf32>
    %cst_12 = arith.constant dense<0.000000e+00> : vector<8xf32>
    %24 = vector.multi_reduction <add>, %23, %cst_12 [1] : vector<8x8xf32> to vector<8xf32>
    %25 = vector.shape_cast %24 : vector<8xf32> to vector<8x1xf32>
    %26 = arith.truncf %23 : vector<8x8xf32> to vector<8x8xbf16>
    %27 = vector.extract_strided_slice %15 {offsets = [0, 0], sizes = [8, 4], strides = [1, 1]} : vector<8x32xbf16> to vector<8x4xbf16>
    %cst_13 = arith.constant dense<0.000000e+00> : vector<8x4xf32>
    %28 = tpu.matmul %26, %27, %cst_13 {dimension_numbers = #tpu.dot_dimension_numbers<[1], [0], [0], [1], [0, 0, 1, 1], [], []>} : vector<8x8xbf16>, vector<8x4xbf16>, vector<8x4xf32> -> vector<8x4xf32>
    %29 = tpu.reciprocal %25 {approx = true} : vector<8x1xf32> -> vector<8x1xf32>
    %30 = vector.broadcast %29 : vector<8x1xf32> to vector<8x4xf32>
    %31 = arith.mulf %28, %30 : vector<8x4xf32>
    %32 = arith.truncf %31 : vector<8x4xf32> to vector<8x4xbf16>
    %c0_14 = arith.constant 0 : index
    %c0_15 = arith.constant 0 : index
    %33 = vector.load %arg10[%c0_14, %c0_15] : memref<8x32xbf16, #tpu.memory_space<vmem>>, vector<8x4xbf16>
    tpu.vector_store %arg10[%c0_14, %c0_15], %32 {strides = array<i32>} : memref<8x32xbf16, #tpu.memory_space<vmem>>, vector<8x4xbf16>,
    %34 = vector.extract_strided_slice %13 {offsets = [0, 4], sizes = [8, 4], strides = [1, 1]} : vector<8x32xbf16> to vector<8x4xbf16>
    %35 = vector.extract_strided_slice %14 {offsets = [0, 4], sizes = [8, 4], strides = [1, 1]} : vector<8x32xbf16> to vector<8x4xbf16>
    %cst_16 = arith.constant dense<0.000000e+00> : vector<8x8xf32>
    %36 = tpu.matmul %34, %35, %cst_16 {dimension_numbers = #tpu.dot_dimension_numbers<[1], [1], [0], [0], [0, 0, 1, 0], [], []>} : vector<8x4xbf16>, vector<8x4xbf16>, vector<8x8xf32> -> vector<8x8xf32>
    %cst_17 = arith.constant dense<0xFF800000> : vector<8xf32>
    %37 = vector.multi_reduction <maximumf>, %36, %cst_17 [1] : vector<8x8xf32> to vector<8xf32>
    %38 = vector.shape_cast %37 : vector<8xf32> to vector<8x1xf32>
    %39 = vector.broadcast %38 : vector<8x1xf32> to vector<8x8xf32>
    %40 = arith.subf %36, %39 : vector<8x8xf32>
    %41 = math.exp %40 : vector<8x8xf32>
    %cst_18 = arith.constant dense<0.000000e+00> : vector<8xf32>
    %42 = vector.multi_reduction <add>, %41, %cst_18 [1] : vector<8x8xf32> to vector<8xf32>
    %43 = vector.shape_cast %42 : vector<8xf32> to vector<8x1xf32>
    %44 = arith.truncf %41 : vector<8x8xf32> to vector<8x8xbf16>
    %45 = vector.extract_strided_slice %15 {offsets = [0, 4], sizes = [8, 4], strides = [1, 1]} : vector<8x32xbf16> to vector<8x4xbf16>
    %cst_19 = arith.constant dense<0.000000e+00> : vector<8x4xf32>
    %46 = tpu.matmul %44, %45, %cst_19 {dimension_numbers = #tpu.dot_dimension_numbers<[1], [0], [0], [1], [0, 0, 1, 1], [], []>} : vector<8x8xbf16>, vector<8x4xbf16>, vector<8x4xf32> -> vector<8x4xf32>
    %47 = tpu.reciprocal %43 {approx = true} : vector<8x1xf32> -> vector<8x1xf32>
    %48 = vector.broadcast %47 : vector<8x1xf32> to vector<8x4xf32>
    %49 = arith.mulf %46, %48 : vector<8x4xf32>
    %50 = arith.truncf %49 : vector<8x4xf32> to vector<8x4xbf16>
    %c0_20 = arith.constant 0 : index
    %c4 = arith.constant 4 : index
    %51 = vector.load %arg10[%c0_20, %c4] : memref<8x32xbf16, #tpu.memory_space<vmem>>, vector<8x4xbf16>
    tpu.vector_store %arg10[%c0_20, %c4], %50 {strides = array<i32>} : memref<8x32xbf16, #tpu.memory_space<vmem>>, vector<8x4xbf16>,
    %52 = vector.extract_strided_slice %13 {offsets = [0, 8], sizes = [8, 4], strides = [1, 1]} : vector<8x32xbf16> to vector<8x4xbf16>
    %53 = vector.extract_strided_slice %14 {offsets = [0, 8], sizes = [8, 4], strides = [1, 1]} : vector<8x32xbf16> to vector<8x4xbf16>
    %cst_21 = arith.constant dense<0.000000e+00> : vector<8x8xf32>
    %54 = tpu.matmul %52, %53, %cst_21 {dimension_numbers = #tpu.dot_dimension_numbers<[1], [1], [0], [0], [0, 0, 1, 0], [], []>} : vector<8x4xbf16>, vector<8x4xbf16>, vector<8x8xf32> -> vector<8x8xf32>
    %cst_22 = arith.constant dense<0xFF800000> : vector<8xf32>
    %55 = vector.multi_reduction <maximumf>, %54, %cst_22 [1] : vector<8x8xf32> to vector<8xf32>
    %56 = vector.shape_cast %55 : vector<8xf32> to vector<8x1xf32>
    %57 = vector.broadcast %56 : vector<8x1xf32> to vector<8x8xf32>
    %58 = arith.subf %54, %57 : vector<8x8xf32>
    %59 = math.exp %58 : vector<8x8xf32>
    %cst_23 = arith.constant dense<0.000000e+00> : vector<8xf32>
    %60 = vector.multi_reduction <add>, %59, %cst_23 [1] : vector<8x8xf32> to vector<8xf32>
    %61 = vector.shape_cast %60 : vector<8xf32> to vector<8x1xf32>
    %62 = arith.truncf %59 : vector<8x8xf32> to vector<8x8xbf16>
    %63 = vector.extract_strided_slice %15 {offsets = [0, 8], sizes = [8, 4], strides = [1, 1]} : vector<8x32xbf16> to vector<8x4xbf16>
    %cst_24 = arith.constant dense<0.000000e+00> : vector<8x4xf32>
    %64 = tpu.matmul %62, %63, %cst_24 {dimension_numbers = #tpu.dot_dimension_numbers<[1], [0], [0], [1], [0, 0, 1, 1], [], []>} : vector<8x8xbf16>, vector<8x4xbf16>, vector<8x4xf32> -> vector<8x4xf32>
    %65 = tpu.reciprocal %61 {approx = true} : vector<8x1xf32> -> vector<8x1xf32>
    %66 = vector.broadcast %65 : vector<8x1xf32> to vector<8x4xf32>
    %67 = arith.mulf %64, %66 : vector<8x4xf32>
    %68 = arith.truncf %67 : vector<8x4xf32> to vector<8x4xbf16>
    %c0_25 = arith.constant 0 : index
    %c8 = arith.constant 8 : index
    %69 = vector.load %arg10[%c0_25, %c8] : memref<8x32xbf16, #tpu.memory_space<vmem>>, vector<8x4xbf16>
    tpu.vector_store %arg10[%c0_25, %c8], %68 {strides = array<i32>} : memref<8x32xbf16, #tpu.memory_space<vmem>>, vector<8x4xbf16>,
    %70 = vector.extract_strided_slice %13 {offsets = [0, 12], sizes = [8, 4], strides = [1, 1]} : vector<8x32xbf16> to vector<8x4xbf16>
    %71 = vector.extract_strided_slice %14 {offsets = [0, 12], sizes = [8, 4], strides = [1, 1]} : vector<8x32xbf16> to vector<8x4xbf16>
    %cst_26 = arith.constant dense<0.000000e+00> : vector<8x8xf32>
    %72 = tpu.matmul %70, %71, %cst_26 {dimension_numbers = #tpu.dot_dimension_numbers<[1], [1], [0], [0], [0, 0, 1, 0], [], []>} : vector<8x4xbf16>, vector<8x4xbf16>, vector<8x8xf32> -> vector<8x8xf32>
    %cst_27 = arith.constant dense<0xFF800000> : vector<8xf32>
    %73 = vector.multi_reduction <maximumf>, %72, %cst_27 [1] : vector<8x8xf32> to vector<8xf32>
    %74 = vector.shape_cast %73 : vector<8xf32> to vector<8x1xf32>
    %75 = vector.broadcast %74 : vector<8x1xf32> to vector<8x8xf32>
    %76 = arith.subf %72, %75 : vector<8x8xf32>
    %77 = math.exp %76 : vector<8x8xf32>
    %cst_28 = arith.constant dense<0.000000e+00> : vector<8xf32>
    %78 = vector.multi_reduction <add>, %77, %cst_28 [1] : vector<8x8xf32> to vector<8xf32>
    %79 = vector.shape_cast %78 : vector<8xf32> to vector<8x1xf32>
    %80 = arith.truncf %77 : vector<8x8xf32> to vector<8x8xbf16>
    %81 = vector.extract_strided_slice %15 {offsets = [0, 12], sizes = [8, 4], strides = [1, 1]} : vector<8x32xbf16> to vector<8x4xbf16>
    %cst_29 = arith.constant dense<0.000000e+00> : vector<8x4xf32>
    %82 = tpu.matmul %80, %81, %cst_29 {dimension_numbers = #tpu.dot_dimension_numbers<[1], [0], [0], [1], [0, 0, 1, 1], [], []>} : vector<8x8xbf16>, vector<8x4xbf16>, vector<8x4xf32> -> vector<8x4xf32>
    %83 = tpu.reciprocal %79 {approx = true} : vector<8x1xf32> -> vector<8x1xf32>
    %84 = vector.broadcast %83 : vector<8x1xf32> to vector<8x4xf32>
    %85 = arith.mulf %82, %84 : vector<8x4xf32>
    %86 = arith.truncf %85 : vector<8x4xf32> to vector<8x4xbf16>
    %c0_30 = arith.constant 0 : index
    %c12 = arith.constant 12 : index
    %87 = vector.load %arg10[%c0_30, %c12] : memref<8x32xbf16, #tpu.memory_space<vmem>>, vector<8x4xbf16>
    tpu.vector_store %arg10[%c0_30, %c12], %86 {strides = array<i32>} : memref<8x32xbf16, #tpu.memory_space<vmem>>, vector<8x4xbf16>,
    %88 = vector.extract_strided_slice %13 {offsets = [0, 16], sizes = [8, 4], strides = [1, 1]} : vector<8x32xbf16> to vector<8x4xbf16>
    %89 = vector.extract_strided_slice %14 {offsets = [0, 16], sizes = [8, 4], strides = [1, 1]} : vector<8x32xbf16> to vector<8x4xbf16>
    %cst_31 = arith.constant dense<0.000000e+00> : vector<8x8xf32>
    %90 = tpu.matmul %88, %89, %cst_31 {dimension_numbers = #tpu.dot_dimension_numbers<[1], [1], [0], [0], [0, 0, 1, 0], [], []>} : vector<8x4xbf16>, vector<8x4xbf16>, vector<8x8xf32> -> vector<8x8xf32>
    %cst_32 = arith.constant dense<0xFF800000> : vector<8xf32>
    %91 = vector.multi_reduction <maximumf>, %90, %cst_32 [1] : vector<8x8xf32> to vector<8xf32>
    %92 = vector.shape_cast %91 : vector<8xf32> to vector<8x1xf32>
    %93 = vector.broadcast %92 : vector<8x1xf32> to vector<8x8xf32>
    %94 = arith.subf %90, %93 : vector<8x8xf32>
    %95 = math.exp %94 : vector<8x8xf32>
    %cst_33 = arith.constant dense<0.000000e+00> : vector<8xf32>
    %96 = vector.multi_reduction <add>, %95, %cst_33 [1] : vector<8x8xf32> to vector<8xf32>
    %97 = vector.shape_cast %96 : vector<8xf32> to vector<8x1xf32>
    %98 = arith.truncf %95 : vector<8x8xf32> to vector<8x8xbf16>
    %99 = vector.extract_strided_slice %15 {offsets = [0, 16], sizes = [8, 4], strides = [1, 1]} : vector<8x32xbf16> to vector<8x4xbf16>
    %cst_34 = arith.constant dense<0.000000e+00> : vector<8x4xf32>
    %100 = tpu.matmul %98, %99, %cst_34 {dimension_numbers = #tpu.dot_dimension_numbers<[1], [0], [0], [1], [0, 0, 1, 1], [], []>} : vector<8x8xbf16>, vector<8x4xbf16>, vector<8x4xf32> -> vector<8x4xf32>
    %101 = tpu.reciprocal %97 {approx = true} : vector<8x1xf32> -> vector<8x1xf32>
    %102 = vector.broadcast %101 : vector<8x1xf32> to vector<8x4xf32>
    %103 = arith.mulf %100, %102 : vector<8x4xf32>
    %104 = arith.truncf %103 : vector<8x4xf32> to vector<8x4xbf16>
    %c0_35 = arith.constant 0 : index
    %c16 = arith.constant 16 : index
    %105 = vector.load %arg10[%c0_35, %c16] : memref<8x32xbf16, #tpu.memory_space<vmem>>, vector<8x4xbf16>
    tpu.vector_store %arg10[%c0_35, %c16], %104 {strides = array<i32>} : memref<8x32xbf16, #tpu.memory_space<vmem>>, vector<8x4xbf16>,
    %106 = vector.extract_strided_slice %13 {offsets = [0, 20], sizes = [8, 4], strides = [1, 1]} : vector<8x32xbf16> to vector<8x4xbf16>
    %107 = vector.extract_strided_slice %14 {offsets = [0, 20], sizes = [8, 4], strides = [1, 1]} : vector<8x32xbf16> to vector<8x4xbf16>
    %cst_36 = arith.constant dense<0.000000e+00> : vector<8x8xf32>
    %108 = tpu.matmul %106, %107, %cst_36 {dimension_numbers = #tpu.dot_dimension_numbers<[1], [1], [0], [0], [0, 0, 1, 0], [], []>} : vector<8x4xbf16>, vector<8x4xbf16>, vector<8x8xf32> -> vector<8x8xf32>
    %cst_37 = arith.constant dense<0xFF800000> : vector<8xf32>
    %109 = vector.multi_reduction <maximumf>, %108, %cst_37 [1] : vector<8x8xf32> to vector<8xf32>
    %110 = vector.shape_cast %109 : vector<8xf32> to vector<8x1xf32>
    %111 = vector.broadcast %110 : vector<8x1xf32> to vector<8x8xf32>
    %112 = arith.subf %108, %111 : vector<8x8xf32>
    %113 = math.exp %112 : vector<8x8xf32>
    %cst_38 = arith.constant dense<0.000000e+00> : vector<8xf32>
    %114 = vector.multi_reduction <add>, %113, %cst_38 [1] : vector<8x8xf32> to vector<8xf32>
    %115 = vector.shape_cast %114 : vector<8xf32> to vector<8x1xf32>
    %116 = arith.truncf %113 : vector<8x8xf32> to vector<8x8xbf16>
    %117 = vector.extract_strided_slice %15 {offsets = [0, 20], sizes = [8, 4], strides = [1, 1]} : vector<8x32xbf16> to vector<8x4xbf16>
    %cst_39 = arith.constant dense<0.000000e+00> : vector<8x4xf32>
    %118 = tpu.matmul %116, %117, %cst_39 {dimension_numbers = #tpu.dot_dimension_numbers<[1], [0], [0], [1], [0, 0, 1, 1], [], []>} : vector<8x8xbf16>, vector<8x4xbf16>, vector<8x4xf32> -> vector<8x4xf32>
    %119 = tpu.reciprocal %115 {approx = true} : vector<8x1xf32> -> vector<8x1xf32>
    %120 = vector.broadcast %119 : vector<8x1xf32> to vector<8x4xf32>
    %121 = arith.mulf %118, %120 : vector<8x4xf32>
    %122 = arith.truncf %121 : vector<8x4xf32> to vector<8x4xbf16>
    %c0_40 = arith.constant 0 : index
    %c20 = arith.constant 20 : index
    %123 = vector.load %arg10[%c0_40, %c20] : memref<8x32xbf16, #tpu.memory_space<vmem>>, vector<8x4xbf16>
    tpu.vector_store %arg10[%c0_40, %c20], %122 {strides = array<i32>} : memref<8x32xbf16, #tpu.memory_space<vmem>>, vector<8x4xbf16>,
    %124 = vector.extract_strided_slice %13 {offsets = [0, 24], sizes = [8, 4], strides = [1, 1]} : vector<8x32xbf16> to vector<8x4xbf16>
    %125 = vector.extract_strided_slice %14 {offsets = [0, 24], sizes = [8, 4], strides = [1, 1]} : vector<8x32xbf16> to vector<8x4xbf16>
    %cst_41 = arith.constant dense<0.000000e+00> : vector<8x8xf32>
    %126 = tpu.matmul %124, %125, %cst_41 {dimension_numbers = #tpu.dot_dimension_numbers<[1], [1], [0], [0], [0, 0, 1, 0], [], []>} : vector<8x4xbf16>, vector<8x4xbf16>, vector<8x8xf32> -> vector<8x8xf32>
    %cst_42 = arith.constant dense<0xFF800000> : vector<8xf32>
    %127 = vector.multi_reduction <maximumf>, %126, %cst_42 [1] : vector<8x8xf32> to vector<8xf32>
    %128 = vector.shape_cast %127 : vector<8xf32> to vector<8x1xf32>
    %129 = vector.broadcast %128 : vector<8x1xf32> to vector<8x8xf32>
    %130 = arith.subf %126, %129 : vector<8x8xf32>
    %131 = math.exp %130 : vector<8x8xf32>
    %cst_43 = arith.constant dense<0.000000e+00> : vector<8xf32>
    %132 = vector.multi_reduction <add>, %131, %cst_43 [1] : vector<8x8xf32> to vector<8xf32>
    %133 = vector.shape_cast %132 : vector<8xf32> to vector<8x1xf32>
    %134 = arith.truncf %131 : vector<8x8xf32> to vector<8x8xbf16>
    %135 = vector.extract_strided_slice %15 {offsets = [0, 24], sizes = [8, 4], strides = [1, 1]} : vector<8x32xbf16> to vector<8x4xbf16>
    %cst_44 = arith.constant dense<0.000000e+00> : vector<8x4xf32>
    %136 = tpu.matmul %134, %135, %cst_44 {dimension_numbers = #tpu.dot_dimension_numbers<[1], [0], [0], [1], [0, 0, 1, 1], [], []>} : vector<8x8xbf16>, vector<8x4xbf16>, vector<8x4xf32> -> vector<8x4xf32>
    %137 = tpu.reciprocal %133 {approx = true} : vector<8x1xf32> -> vector<8x1xf32>
    %138 = vector.broadcast %137 : vector<8x1xf32> to vector<8x4xf32>
    %139 = arith.mulf %136, %138 : vector<8x4xf32>
    %140 = arith.truncf %139 : vector<8x4xf32> to vector<8x4xbf16>
    %c0_45 = arith.constant 0 : index
    %c24 = arith.constant 24 : index
    %141 = vector.load %arg10[%c0_45, %c24] : memref<8x32xbf16, #tpu.memory_space<vmem>>, vector<8x4xbf16>
    tpu.vector_store %arg10[%c0_45, %c24], %140 {strides = array<i32>} : memref<8x32xbf16, #tpu.memory_space<vmem>>, vector<8x4xbf16>,
    %142 = vector.extract_strided_slice %13 {offsets = [0, 28], sizes = [8, 4], strides = [1, 1]} : vector<8x32xbf16> to vector<8x4xbf16>
    %143 = vector.extract_strided_slice %14 {offsets = [0, 28], sizes = [8, 4], strides = [1, 1]} : vector<8x32xbf16> to vector<8x4xbf16>
    %cst_46 = arith.constant dense<0.000000e+00> : vector<8x8xf32>
    %144 = tpu.matmul %142, %143, %cst_46 {dimension_numbers = #tpu.dot_dimension_numbers<[1], [1], [0], [0], [0, 0, 1, 0], [], []>} : vector<8x4xbf16>, vector<8x4xbf16>, vector<8x8xf32> -> vector<8x8xf32>
    %cst_47 = arith.constant dense<0xFF800000> : vector<8xf32>
    %145 = vector.multi_reduction <maximumf>, %144, %cst_47 [1] : vector<8x8xf32> to vector<8xf32>
    %146 = vector.shape_cast %145 : vector<8xf32> to vector<8x1xf32>
    %147 = vector.broadcast %146 : vector<8x1xf32> to vector<8x8xf32>
    %148 = arith.subf %144, %147 : vector<8x8xf32>
    %149 = math.exp %148 : vector<8x8xf32>
    %cst_48 = arith.constant dense<0.000000e+00> : vector<8xf32>
    %150 = vector.multi_reduction <add>, %149, %cst_48 [1] : vector<8x8xf32> to vector<8xf32>
    %151 = vector.shape_cast %150 : vector<8xf32> to vector<8x1xf32>
    %152 = arith.truncf %149 : vector<8x8xf32> to vector<8x8xbf16>
    %153 = vector.extract_strided_slice %15 {offsets = [0, 28], sizes = [8, 4], strides = [1, 1]} : vector<8x32xbf16> to vector<8x4xbf16>
    %cst_49 = arith.constant dense<0.000000e+00> : vector<8x4xf32>
    %154 = tpu.matmul %152, %153, %cst_49 {dimension_numbers = #tpu.dot_dimension_numbers<[1], [0], [0], [1], [0, 0, 1, 1], [], []>} : vector<8x8xbf16>, vector<8x4xbf16>, vector<8x4xf32> -> vector<8x4xf32>
    %155 = tpu.reciprocal %151 {approx = true} : vector<8x1xf32> -> vector<8x1xf32>
    %156 = vector.broadcast %155 : vector<8x1xf32> to vector<8x4xf32>
    %157 = arith.mulf %154, %156 : vector<8x4xf32>
    %158 = arith.truncf %157 : vector<8x4xf32> to vector<8x4xbf16>
    %c0_50 = arith.constant 0 : index
    %c28 = arith.constant 28 : index
    %159 = vector.load %arg10[%c0_50, %c28] : memref<8x32xbf16, #tpu.memory_space<vmem>>, vector<8x4xbf16>
    tpu.vector_store %arg10[%c0_50, %c28], %158 {strides = array<i32>} : memref<8x32xbf16, #tpu.memory_space<vmem>>, vector<8x4xbf16>,
    %c0_51 = arith.constant 0 : index
    %c0_52 = arith.constant 0 : index
    %160 = vector.load %arg10[%c0_51, %c0_52] : memref<8x32xbf16, #tpu.memory_space<vmem>>, vector<8x32xbf16>
    %c0_53 = arith.constant 0 : index
    %c0_54 = arith.constant 0 : index
    %161 = vector.load %arg5[%c0_53, %c0_54] : memref<32x32xbf16, #tpu.memory_space<vmem>>, vector<32x32xbf16>
    %cst_55 = arith.constant dense<0.000000e+00> : vector<8x32xf32>
    %162 = tpu.matmul %160, %161, %cst_55 {dimension_numbers = #tpu.dot_dimension_numbers<[1], [0], [0], [1], [0, 0, 1, 1], [], []>} : vector<8x32xbf16>, vector<32x32xbf16>, vector<8x32xf32> -> vector<8x32xf32>
    %c0_56 = arith.constant 0 : index
    %c0_57 = arith.constant 0 : index
    %163 = vector.load %arg6[%c0_56, %c0_57] : memref<1x32xf32, #tpu.memory_space<vmem>>, vector<1x32xf32>
    %164 = vector.broadcast %163 : vector<1x32xf32> to vector<8x32xf32>
    %165 = arith.addf %162, %164 : vector<8x32xf32>
    %c0_58 = arith.constant 0 : index
    %c0_59 = arith.constant 0 : index
    %c0_60 = arith.constant 0 : index
    %166 = vector.load %arg7[%c0_58, %c0_59, %c0_60] : memref<1x8x32xf32, #tpu.memory_space<vmem>>, vector<1x8x32xf32>
    %167 = vector.shape_cast %166 : vector<1x8x32xf32> to vector<8x32xf32>
    %168 = vector.shape_cast %165 : vector<8x32xf32> to vector<1x8x32xf32>
    tpu.vector_store %arg7[%c0_58, %c0_59, %c0_60], %168 {strides = array<i32>} : memref<1x8x32xf32, #tpu.memory_space<vmem>>, vector<1x8x32xf32>,
    return
  }
  func.func @transform_0(%arg0: i32, %arg1: i32) -> (i32, i32, i32) {
    %c0_i32 = arith.constant 0 : i32
    %c0_i32_0 = arith.constant 0 : i32
    %c0_i32_1 = arith.constant 0 : i32
    return %arg0, %c0_i32, %c0_i32_0 : i32, i32, i32
  }
  func.func @transform_1(%arg0: i32, %arg1: i32) -> (i32, i32) {
    %c0_i32 = arith.constant 0 : i32
    %c0_i32_0 = arith.constant 0 : i32
    %c0_i32_1 = arith.constant 0 : i32
    return %c0_i32, %c0_i32_0 : i32, i32
  }
  func.func @transform_2(%arg0: i32, %arg1: i32) -> (i32, i32) {
    %c0_i32 = arith.constant 0 : i32
    %c0_i32_0 = arith.constant 0 : i32
    %c0_i32_1 = arith.constant 0 : i32
    return %c0_i32, %c0_i32_0 : i32, i32
  }
  func.func @transform_3(%arg0: i32, %arg1: i32) -> (i32, i32) {
    %c0_i32 = arith.constant 0 : i32
    %c0_i32_0 = arith.constant 0 : i32
    %c0_i32_1 = arith.constant 0 : i32
    return %c0_i32, %c0_i32_0 : i32, i32
  }
  func.func @transform_4(%arg0: i32, %arg1: i32) -> (i32, i32) {
    %c0_i32 = arith.constant 0 : i32
    %c0_i32_0 = arith.constant 0 : i32
    %c0_i32_1 = arith.constant 0 : i32
    return %c0_i32, %c0_i32_0 : i32, i32
  }
  func.func @transform_5(%arg0: i32, %arg1: i32) -> (i32, i32, i32) {
    %c0_i32 = arith.constant 0 : i32
    %c0_i32_0 = arith.constant 0 : i32
    return %arg0, %arg1, %c0_i32 : i32, i32, i32
  }
}

</mosaic_0001>

<bundles_post_ra>
// kernel: tpu_custom_call.1
= control target key start
LH: loop header
LB: loop body
LE: loop exit
PB: predicated region body
PF: predicated region fallthrough
CT: control target
= control target key end

     0   :  { %10 = vsyncpa [#allocation6], 0  ;;  %s2698_s0 = inlined_call_operand.hbm [shape: bf16[2,8,32], index: 0, kind: input, shape index: {}]   ;;  %s2699_s1 = inlined_call_operand.hbm [shape: bf16[32,96], index: 1, kind: input, shape index: {}]   ;;  %s2700_s2 = inlined_call_operand.vmem [shape: f32[1,96], index: 2, kind: input, shape index: {}]   ;;  %s2701_s3 = inlined_call_operand.hbm [shape: bf16[32,32], index: 3, kind: input, shape index: {}]   ;;  %s2702_s4 = inlined_call_operand.vmem [shape: f32[1,32], index: 4, kind: input, shape index: {}]   ;;  %s2703_s5 = inlined_call_operand.hbm [shape: f32[2,8,32], index: 5, kind: output, shape index: {}]  }
   0x1   :  { %12 = vsyncpa [#allocation6 + $0x1], 0 }
   0x2   :  { %13 = vsyncpa [#allocation9], 0 }
   0x3   :  { %14 = vsyncpa [#allocation7], 0 }
   0x4   :  { %16 = vsyncpa [#allocation7 + $0x1], 0  ;;  %s2255_s18 = smov 0   ;;  %s2257_s19 = smov 0  }
   0x5   :  { %s2259_s20 = smov 0   ;;  %s2261_s21 = smov 0  }
   0x6   :  { %s2263_s22 = smov 0   ;;  %s2265_s23 = smov 0  }
   0x7 LB: > { %s1645_s24 = sadd.s32 4294967295, %s2199_s23   ;;  %s1646_s25 = sadd.s32 4294967294, %s2199_s23   ;;  %s2199_s23 = sphi %s2265_s23, %s22_s23   ;;  %s2195_s22 = sphi %s2263_s22, %s2725_s22   ;;  %s2191_s21 = sphi %s2261_s21, %s2724_s21   ;;  %s2187_s20 = sphi %s2259_s20, %s2723_s20   ;;  %s2183_s19 = sphi %s2257_s19, %s2722_s19   ;;  %s2179_s18 = sphi %s2255_s18, %s2721_s18  }
   0x8   : > { %p54_p0 = scmp.ne.s32.totalorder %s2183_s19, %s2179_s18  ;;  %p2289_p1 = scmp.eq.s32.totalorder %s1645_s24, 0 }
   0x9   : > { %p2293_p2 = scmp.eq.s32.totalorder %s1645_s24, 1  ;;  %p170_p3 = scmp.eq.s32.totalorder %s1646_s25, 1 }
   0xa   : > { %s2708_s26 = scalar_select %p2289_p1, 1, 0 }
   0xb   : > { %p2299_p4 = por %p2289_p1, %p54_p0  ;;  %p1647_p5 = scmp.ge.s32.totalorder %s2199_s23, 1 }
   0xc   : > { %p2304_p6 = por %p170_p3, %p54_p0  ;;  %p177_p7 = scmp.lt.s32.totalorder %s2199_s23, 3 }
   0xd   : > { %s2710_s28 = scalar_select %p2299_p4, 1, 0 }
   0xe   : > { %s2711_s29 = scalar_select %p2304_p6, 1, 0 }
   0xf   : > { %p2309_p8 = pnand %p1647_p5, %p177_p7  ;;  %s2201_s6 = smov [#allocation8]  }
  0x10   : > { %s189_s7 = sshll.u32 %s2201_s6, 4  ;;  %s2202_s9 = smov [#allocation10]   ;;  %s2313_s7 = int_to_ptr.vmem [resolvable:$true] %s189_s7 }
  0x11   : > { %p1894_p9 = pneg %p2309_p8  ;;  %s205_s10 = sshll.u32 %s2202_s9, 4  ;;  %s2324_s10 = int_to_ptr.vmem [resolvable:$true] %s205_s10 }
  0x12   : > { %s2027_s13 = scalar_lea.hbm %s2699_s1, 256 }
  0x13   : > { %p2320_p11 = pnand %p1894_p9, %p2289_p1  ;;  %p2028_p12 = scmp.ne.s32.totalorder %s2699_s1, %s2027_s13 }
  0x14   : > { %p2034_p5 = scmp.lt.u32.totalorder %s2027_s13, %s2699_s1 }
  0x15   : > { %p2029_p13 = pneg %p2320_p11 }
  0x17   : > { %p2030_p0 = pnand %p2029_p13, %p2028_p12 }
  0x19   : > { %p2031_p3 = pneg %p2030_p0 }
  0x1b   : > { %p2036_p7 = pnand %p2034_p5, %p2031_p3 }
  0x1d   : > { %2039 = shalt.err (!%p2036_p7)
}
  0x1e   : > { %s2040_s24 = scalar_lea.vmem %s2313_s7, 256  ;;  %p2048_p1 = scmp.lt.s32.totalorder %s2313_s7, %s2313_s7 }
  0x1f   : > { %p2041_p9 = scmp.ne.s32.totalorder %s2313_s7, %s2040_s24  ;;  %p2049_p12 = scmp.lt.s32.totalorder %s2040_s24, %s2040_s24 }
  0x21   : > { %p2043_p10 = pnand %p2041_p9, %p2029_p13  ;;  %p2050_p0 = por %p2049_p12, %p2048_p1 }
  0x23   : > { %p2044_p6 = pneg %p2043_p10 }
  0x25   : > { %p2051_p4 = pnand %p2050_p0, %p2044_p6 }
  0x27   : > { %2054 = shalt.err (!%p2051_p4)
}
  0x28   : > { %s2203_s25 = smov 64   ;;  %s2204_s6 = smov 4  }
  0x29   : > { %1897 = dma.hbm_to_vmem [thread:$0]  (!%p2320_p11), %s2699_s1, 256, %s2313_s7, [#allocation9], %s2203_s25, %s2203_s25, %s2204_s6  }
  0x2a   : > { %s2055_s14 = scalar_lea.hbm %s2701_s3, 256 }
  0x2b   : > { %p2056_p1 = scmp.ne.s32.totalorder %s2701_s3, %s2055_s14  ;;  %p2062_p10 = scmp.lt.u32.totalorder %s2055_s14, %s2701_s3 }
  0x2d   : > { %p2058_p4 = pnand %p2056_p1, %p2029_p13 }
  0x2f   : > { %p2059_p6 = pneg %p2058_p4 }
  0x31   : > { %p2064_p3 = pnand %p2062_p10, %p2059_p6 }
  0x33   : > { %2067 = shalt.err (!%p2064_p3)
}
  0x34   : > { %s2068_s7 = scalar_lea.vmem %s2324_s10, 256  ;;  %p2076_p12 = scmp.lt.s32.totalorder %s2324_s10, %s2324_s10 }
  0x35   : > { %p2069_p5 = scmp.ne.s32.totalorder %s2324_s10, %s2068_s7  ;;  %p2077_p0 = scmp.lt.s32.totalorder %s2068_s7, %s2068_s7 }
  0x37   : > { %p2071_p7 = pnand %p2069_p5, %p2029_p13  ;;  %p2078_p1 = por %p2077_p0, %p2076_p12 }
  0x39   : > { %p2072_p9 = pneg %p2071_p7 }
  0x3b   : > { %p2079_p4 = pnand %p2078_p1, %p2072_p9 }
  0x3d   : > { %2082 = shalt.err (!%p2079_p4)
}
  0x3e   : > { %1900 = dma.hbm_to_vmem [thread:$0]  (!%p2320_p11), %s2701_s3, 256, %s2324_s10, [#allocation9], %s2203_s25, %s2203_s25, %s2204_s6  }
  0x3f   : > { %s34_s12 = sadd.s32 1, %s2195_s22  ;;  %s41_s13 = sadd.s32 1, %s2187_s20 }
  0x40   : > { %p36_p13 = scmp.ge.s32.totalorder %s34_s12, 2  ;;  %p48_p6 = scmp.ne.s32.totalorder %s2187_s20, %s2183_s19 }
  0x41   : > { %p49_p10 = scmp.eq.s32.totalorder %s2199_s23, 0  ;;  %p1911_p3 = scmp.lt.s32.totalorder %s2199_s23, 2 }
  0x42   : > { %s2727_s12 = smov (%p36_p13, %s34_s12), 0  ;;  %p2388_p7 = por %p2293_p2, %p48_p6 }
  0x43   : > { %p50_p5 = por %p49_p10, %p48_p6  ;;  %s38_s14 = ssub.s32 %s2195_s22, %s2727_s12 }
  0x44   : > { %s2714_s8 = scalar_select %p2388_p7, 1, 0 }
  0x45   : > { %s222_s15 = sand.u32 1, %s2187_s20   ;;  %p39_p9 = scmp.eq.s32.totalorder %s38_s14, 0 }
  0x46   : > { %s1651_s10 = sshll.u32 %s222_s15, 2  ;;  %s1652_s25 = sshll.u32 %s2195_s22, 6 }
  0x47   : > { %s2397_s6 = scalar_select %p39_p9, %s2187_s20, %s41_s13  }
  0x48   : > { %s2402_s24 = scalar_lea.hbm %s2698_s0, %s1652_s25  ;;  %s226_s27 = scalar_lea.vmem [#allocation5], %s1651_s10 }
  0x49   : > { %s233_s7 = sshll.u32 %s226_s27, 4  ;;  %p2406_p2 = pnand %p1911_p3, %p50_p5  ;;  %s2410_s7 = int_to_ptr.vmem [resolvable:$true] %s233_s7 }
  0x4a   : > { %s223_s11 = scalar_lea.sflag [#allocation6], %s222_s15  ;;  %s2083_s13 = scalar_lea.hbm %s2402_s24, 64 }
  0x4b   : > { %p2084_p11 = scmp.ne.s32.totalorder %s2402_s24, %s2083_s13  ;;  %p2085_p12 = pneg %p2406_p2 }
  0x4c   : > { %s2088_s25 = scalar_lea.hbm %s2698_s0, 128  ;;  %p2089_p4 = scmp.lt.u32.totalorder %s2402_s24, %s2698_s0 }
  0x4d   : > { %p2086_p0 = pnand %p2085_p12, %p2084_p11  ;;  %p2090_p13 = scmp.lt.u32.totalorder %s2088_s25, %s2083_s13 }
  0x4e   : > { %p2092_p10 = scmp.lt.u32.totalorder %s2083_s13, %s2402_s24 }
  0x4f   : > { %p2087_p1 = pneg %p2086_p0  ;;  %p2091_p6 = por %p2090_p13, %p2089_p4 }
  0x51   : > { %p2093_p3 = por %p2092_p10, %p2091_p6 }
  0x53   : > { %p2094_p5 = pnand %p2093_p3, %p2087_p1 }
  0x55   : > { %2097 = shalt.err (!%p2094_p5)
}
  0x56   : > { %s2098_s15 = scalar_lea.vmem %s2410_s7, 64  ;;  %s2205_s27 = smov [#allocation5]  }
  0x57   : > { %p2099_p9 = scmp.ne.s32.totalorder %s2410_s7, %s2098_s15  ;;  %s2103_s14 = sshll.u32 %s2205_s27, 4  ;;  %s2104_s14 = int_to_ptr.vmem [resolvable:$false] %s2103_s14 }
  0x58   : > { %s2105_s10 = scalar_lea.vmem %s2104_s14, 128  ;;  %p2106_p7 = scmp.lt.s32.totalorder %s2410_s7, %s2104_s14 }
  0x59   : > { %p2101_p11 = pnand %p2099_p9, %p2085_p12  ;;  %p2107_p4 = scmp.lt.s32.totalorder %s2105_s10, %s2098_s15 }
  0x5b   : > { %p2102_p0 = pneg %p2101_p11  ;;  %p2108_p13 = por %p2107_p4, %p2106_p7 }
  0x5d   : > { %p2109_p6 = pnand %p2108_p13, %p2102_p0 }
  0x5f   : > { %2112 = shalt.err (!%p2109_p6)
}
  0x60   : > { %1904 = dma.hbm_to_vmem [thread:$0]  (!%p2406_p2), %s2402_s24, 64, %s2410_s7, %s223_s11  }
  0x61   : > { %242 = sbr.rel (%p2309_p8) target bundleno = 1598 (0x63e), region = 40  ;;  %s2440_s13 = sand.u32 (!%p2309_p8), 1, %s2183_s19  }
  0x62   : > { %s1654_s25 = sshll.u32 (!%p2309_p8), %s2440_s13, 2  ;;  %s245_s16 = scalar_lea.sflag (!%p2309_p8), [#allocation6], %s2440_s13 }
  0x63   : > { %s2444_s17 = scalar_lea.vmem (!%p2309_p8), [#allocation5], %s1654_s25  ;;  %p2716_p7 = scmp.ne.s32.totalorder (!%p2309_p8), %s2710_s28, 0 }
  0x68   : > { %2166 = dma.done.wait (%p2716_p7), %s245_s16, 64  }
  0x69   : > { %2168 = vsyncadd (%p2716_p7), %s245_s16, 4294967232  ;;  %p2717_p2 = scmp.ne.s32.totalorder %s2708_s26, 0 }
  0x6b   : > { %2170 = dma.done.wait (%p2717_p2), [#allocation9], 512  }
  0x6c   : > { %2172 = vsyncadd (%p2717_p2), [#allocation9], 4294966784  ;;  %v2206_v0 = vmov 0.0   ;;  %vm2207_vm0 = vmmov 0   ;;  %v1985_v1 = vld [vmem:[#allocation8] sm:$0xff]   ;;  %s2208_s28 = smov 96  }
  0x6d   : > { %1754 = vmatprep.subr.bf16.mxu0 %v2206_v0  ;;  %1758 = vmatprep.mubr.msk.bf16.mxu0 %vm2207_vm0, %v2206_v0  ;;  %v1986_v2 = vld [vmem:[#allocation8 + $0x8] sm:$0xff]   ;;  %v1989_v4 = vld [vmem:[#allocation8] sm:$0xff]   ;;  %s2209_s24 = smov 64   ;;  %v288_v9 = vld [vmem:[%s2444_s17] sm:$0xf]  ;;  %vm318_vm1 = vcmask 261120  }
  0x6e   : > { %1762 = vmatprep.subr.bf16.mxu1 %v2206_v0  ;;  %1766 = vmatprep.mubr.msk.bf16.mxu1 %vm2207_vm0, %v2206_v0  ;;  %v2463_v3 = vld [vmem:[%s2700_s2] ss:$0 sm:$0xff]  ;;  %v1987_v10 = vld [vmem:[#allocation8] sm:$0xff]   ;;  %v441_v14 = vld [vmem:[%s2444_s17] sm:$0xf]  ;;  %vm363_vm2 = vcmask 257024  }
  0x6f   : > { %309 = vrot.lane.b32.xlu0 %v1985_v1, %s2208_s28  ;;  %315 = vrot.lane.b32.xlu1 %v2463_v3, %s2208_s28  ;;  %v1990_v5 = vld [vmem:[#allocation8 + $0x8] sm:$0xff]   ;;  %vm512_vm3 = vcmask 31744   ;;  %s2210_s7 = smov 124   ;;  %s2211_s9 = smov 120   ;;  %vm573_vm4 = vcmask 1043456   ;;  %vm559_vm5 = vcmask 64512  }
  0x70   : > { %v1988_v12 = vld [vmem:[#allocation8 + $0x8] sm:$0xff]   ;;  %s2212_s11 = smov 116   ;;  %s2213_s15 = smov 112   ;;  %vm620_vm6 = vcmask 27648   ;;  %vm746_vm7 = vcmask 60448   ;;  %vm865_vm8 = vcmask 93248  }
  0x71   : > { %s2214_s27 = smov 108   ;;  %s2215_s14 = smov 104   ;;  %vm984_vm9 = vcmask 126048   ;;  %vm1103_vm10 = vcmask 158848   ;;  %vm1222_vm11 = vcmask 191648   ;;  %vm1341_vm12 = vcmask 224448  }
  0x72   : > { %s2216_s10 = smov 100   ;;  %s2217_s25 = smov 4   ;;  %vm1460_vm13 = vcmask 257248  }
  0x73   : > { %311 = vrot.lane.b32.xlu0 %v1986_v2, %s2208_s28  ;;  %385 = vrot.lane.b32.xlu1 %v1989_v4, %s2209_s24  ;;  %s2218_s16 = smov 8   ;;  %s2219_s17 = smov 12  }
  0x74   : > { %s2220_s28 = smov 16   ;;  %s2221_s30 = smov 20  }
  0x75   : > { %s2222_s26 = smov 24   ;;  %p2718_p12 = scmp.ne.s32.totalorder %s2714_s8, 0 }
  0x77   : > { %387 = vrot.lane.b32.xlu0 %v1990_v5, %s2209_s24 }
  0xe1   : > { %v310_v6 = vpop.permute.xlu0 %309  ;;  %v316_v7 = vpop.permute.xlu1 %315 }
  0xe2   : > { %1755 = vmatpush3.bf16.msra.mxu0 %v310_v6 }
  0xe3   : > { %1756 = vmatprep.subr.bf16.mxu0 %v2206_v0 }
  0xe5   : > { %v312_v8 = vpop.permute.xlu0 %311  ;;  %v386_v11 = vpop.permute.xlu1 %385 }
  0xe6   : > { %1757 = vmatpush3.bf16.msra.mxu0 %v312_v8  ;;  %1763 = vmatpush3.bf16.msra.mxu1 %v386_v11 }
  0xe7   : > { %1770 = vmatprep.subr.bf16.mxu0 %v2206_v0  ;;  %1764 = vmatprep.subr.bf16.mxu1 %v2206_v0 }
  0xe9   : > { %1759 = vmatmul.mubr.msk.bf16.vlgmr.msra.gmra.mrb[0].mxu0 %vm318_vm1, %v288_v9  ;;  %v388_v13 = vpop.permute.xlu0 %387 }
  0xea   : > { %1771 = vmatpush3.bf16.msra.mxu0 %v1987_v10  ;;  %1774 = vmatprep.mubr.msk.bf16.mxu0 %vm2207_vm0, %v2206_v0 }
  0xeb   : > { %1772 = vmatprep.subr.bf16.mxu0 %v2206_v0  ;;  %1765 = vmatpush3.bf16.msra.mxu1 %v388_v13 }
  0xec   : > { %1778 = vmatprep.subr.bf16.mxu1 %v2206_v0 }
  0xee   : > { %1773 = vmatpush3.bf16.msra.mxu0 %v1988_v12  ;;  %1767 = vmatmul.mubr.msk.bf16.vlgmr.msra.gmra.mrb[0].mxu1 %vm318_vm1, %v288_v9 }
  0xef   : > { %1784 = vmatprep.subr.bf16.mxu0 %v2206_v0  ;;  %1780 = vmatprep.mubr.msk.bf16.mxu1 %vm2207_vm0, %v2206_v0 }
  0xf1   : > { %1775 = vmatmul.mubr.msk.bf16.vlgmr.msra.gmra.mrb[4].mxu0 %vm318_vm1, %v441_v14 }
  0xf2   : > { %1786 = vmatprep.mubr.msk.bf16.mxu0 %vm2207_vm0, %v2206_v0 }
 0x1bc   : > { %v356_v15 = vpop.f32.mrb[0].mxu0 }
 0x1bd   : > { %v357_v16 = vadd.f32 %v356_v15, %v316_v7  ;;  %v1760_v17 = vpop.f32.mrb[1].mxu0 }
 0x1be   : > { %v359_v18 = vpop.f32.mrb[2].mxu0 }
 0x1bf   : > { %v362_v19 = vpack.c.bf16 %v357_v16, %v357_v16  ;;  %v1761_v20 = vpop.f32.mrb[3].mxu0 }
 0x1c1   : > { %364 = vst.msk [vmem:[#allocation2] sm:$0xf] %vm363_vm2, %v362_v19  ;;  %v428_v30 = vpop.f32.mrb[0].mxu1 }
 0x1c2   : > { %v1768_v31 = vpop.f32.mrb[1].mxu1 }
 0x1c3   : > { %v431_v32 = vpop.f32.mrb[2].mxu1 }
 0x1c4   : > { %v503_v21 = vpop.f32.mrb[4].mxu0  ;;  %v1769_v33 = vpop.f32.mrb[3].mxu1 }
 0x1c5   : > { %v504_v22 = vadd.f32 %v2463_v3, %v503_v21  ;;  %v1776_v23 = vpop.f32.mrb[5].mxu0 }
 0x1c6   : > { %v506_v24 = vpop.f32.mrb[6].mxu0 }
 0x1c7   : > { %v509_v25 = vpack.c.bf16 %v504_v22, %v504_v22  ;;  %v1777_v26 = vpop.f32.mrb[7].mxu0 }
 0x1c8   : > { %v510_v27 = vld [vmem:[#allocation2] sm:$0xf] }
 0x1c9   : > { %623 = vrot.lane.b32.xlu0 %v509_v25, %s2210_s7  ;;  %v517_v28 = vsel %vm512_vm3, %v510_v27, 0  ;;  %v1672_v29 = vcombine.low %v510_v27, %v510_v27 }
 0x1ca   : > { %1779 = vmatpush3.bf16.xpose.msra.mxu1 %v517_v28 }
 0x1cb   : > { %628 = vrot.lane.b32.xlu1 %v1672_v29, %s2210_s7  ;;  %1790 = vmatprep.subr.bf16.mxu1 %v2206_v0 }
 0x1cd   : > { %748 = vrot.lane.b32.xlu0 %v509_v25, %s2211_s9 }
 0x1cf   : > { %750 = vrot.lane.b32.xlu1 %v1672_v29, %s2211_s9 }
 0x1d1   : > { %867 = vrot.lane.b32.xlu0 %v509_v25, %s2212_s11  ;;  %1781 = vmatmul.mubr.msk.bf16.vlgmr.msra.gmra.mrb[4].mxu1 %vm512_vm3, %v509_v25 }
 0x1d2   : > { %1792 = vmatprep.mubr.msk.bf16.mxu1 %vm2207_vm0, %v2206_v0 }
 0x1d3   : > { %869 = vrot.lane.b32.xlu1 %v1672_v29, %s2212_s11 }
 0x1d5   : > { %986 = vrot.lane.b32.xlu0 %v509_v25, %s2213_s15 }
 0x1d7   : > { %988 = vrot.lane.b32.xlu1 %v1672_v29, %s2213_s15 }
 0x1d9   : > { %1105 = vrot.lane.b32.xlu0 %v509_v25, %s2214_s27 }
 0x1db   : > { %1107 = vrot.lane.b32.xlu1 %v1672_v29, %s2214_s27 }
 0x1dd   : > { %1224 = vrot.lane.b32.xlu0 %v509_v25, %s2215_s14 }
 0x1df   : > { %1226 = vrot.lane.b32.xlu1 %v1672_v29, %s2215_s14 }
 0x1e1   : > { %1343 = vrot.lane.b32.xlu0 %v509_v25, %s2216_s10 }
 0x1e3   : > { %1345 = vrot.lane.b32.xlu1 %v1672_v29, %s2216_s10 }
 0x1e7   : > { %391 = vrot.lane.b32.xlu1 %v2463_v3, %s2209_s24  ;;  %s2223_s24 = smov 28  }
 0x23b   : > { %v624_v37 = vpop.permute.xlu0 %623 }
 0x23d   : > { %v629_v34 = vpop.permute.xlu1 %628 }
 0x23e   : > { %v634_v35 = vsel %vm512_vm3, %v629_v34, 0 }
 0x23f   : > { %1791 = vmatpush3.bf16.xpose.msra.mxu1 %v634_v35  ;;  %v749_v41 = vpop.permute.xlu0 %748 }
 0x240   : > { %1802 = vmatprep.subr.bf16.mxu1 %v2206_v0 }
 0x241   : > { %v751_v36 = vpop.permute.xlu1 %750 }
 0x242   : > { %v756_v39 = vsel %vm512_vm3, %v751_v36, 0 }
 0x243   : > { %v868_v45 = vpop.permute.xlu0 %867 }
 0x245   : > { %v870_v38 = vpop.permute.xlu1 %869 }
 0x246   : > { %1793 = vmatmul.mubr.msk.bf16.vlgmr.msra.gmra.mrb[8].mxu1 %vm512_vm3, %v624_v37  ;;  %v875_v43 = vsel %vm512_vm3, %v870_v38, 0 }
 0x247   : > { %1803 = vmatpush3.bf16.xpose.msra.mxu1 %v756_v39  ;;  %1804 = vmatprep.mubr.msk.bf16.mxu1 %vm2207_vm0, %v2206_v0  ;;  %v987_v51 = vpop.permute.xlu0 %986 }
 0x248   : > { %1814 = vmatprep.subr.bf16.mxu1 %v2206_v0 }
 0x249   : > { %v989_v40 = vpop.permute.xlu1 %988 }
 0x24a   : > { %v994_v47 = vsel %vm512_vm3, %v989_v40, 0 }
 0x24b   : > { %v1106_v53 = vpop.permute.xlu0 %1105 }
 0x24d   : > { %v1108_v42 = vpop.permute.xlu1 %1107 }
 0x24e   : > { %1805 = vmatmul.mubr.msk.bf16.vlgmr.msra.gmra.mrb[12].mxu1 %vm512_vm3, %v749_v41  ;;  %v1113_v52 = vsel %vm512_vm3, %v1108_v42, 0 }
 0x24f   : > { %1815 = vmatpush3.bf16.xpose.msra.mxu1 %v875_v43  ;;  %1816 = vmatprep.mubr.msk.bf16.mxu1 %vm2207_vm0, %v2206_v0  ;;  %v1225_v58 = vpop.permute.xlu0 %1224 }
 0x250   : > { %1826 = vmatprep.subr.bf16.mxu1 %v2206_v0 }
 0x251   : > { %v1227_v44 = vpop.permute.xlu1 %1226 }
 0x252   : > { %v1232_v55 = vsel %vm512_vm3, %v1227_v44, 0 }
 0x253   : > { %v1344_v60 = vpop.permute.xlu0 %1343 }
 0x255   : > { %v1346_v46 = vpop.permute.xlu1 %1345 }
 0x256   : > { %1817 = vmatmul.mubr.msk.bf16.vlgmr.msra.gmra.mrb[16].mxu1 %vm512_vm3, %v868_v45  ;;  %v1351_v59 = vsel %vm512_vm3, %v1346_v46, 0 }
 0x257   : > { %1827 = vmatpush3.bf16.xpose.msra.mxu1 %v994_v47  ;;  %1828 = vmatprep.mubr.msk.bf16.mxu1 %vm2207_vm0, %v2206_v0 }
 0x258   : > { %1838 = vmatprep.subr.bf16.mxu1 %v2206_v0 }
 0x259   : > { %v392_v48 = vpop.permute.xlu1 %391 }
 0x25a   : > { %v429_v49 = vadd.f32 %v428_v30, %v392_v48 }
 0x25c   : > { %v434_v50 = vpack.c.bf16 %v429_v49, %v429_v49 }
 0x25e   : > { %1829 = vmatmul.mubr.msk.bf16.vlgmr.msra.gmra.mrb[20].mxu1 %vm512_vm3, %v987_v51  ;;  %435 = vst.msk [vmem:[#allocation3] sm:$0xf] %vm363_vm2, %v434_v50 }
 0x25f   : > { %1839 = vmatpush3.bf16.xpose.msra.mxu1 %v1113_v52  ;;  %1840 = vmatprep.mubr.msk.bf16.mxu1 %vm2207_vm0, %v2206_v0 }
 0x260   : > { %1850 = vmatprep.subr.bf16.mxu1 %v2206_v0 }
 0x265   : > { %v511_v54 = vld [vmem:[#allocation3] sm:$0xf] }
 0x266   : > { %1841 = vmatmul.mubr.msk.bf16.vlgmr.msra.gmra.mrb[24].mxu1 %vm512_vm3, %v1106_v53  ;;  %v2533_v56 = vcombine.low %v511_v54, %v511_v54  ;;  %v575_v57 = vsel %vm573_vm4, %v511_v54, 0 }
 0x267   : > { %1851 = vmatpush3.bf16.xpose.msra.mxu1 %v1232_v55  ;;  %1852 = vmatprep.mubr.msk.bf16.mxu1 %vm2207_vm0, %v2206_v0 }
 0x268   : > { %1862 = vmatprep.subr.bf16.mxu1 %v2206_v0  ;;  %689 = vrot.lane.b32.xlu0 %v2533_v56, %s2210_s7  ;;  %s1657_s7 = sshll.u32 %s2440_s13, 3 }
 0x269   : > { %808 = vrot.lane.b32.xlu1 %v2533_v56, %s2211_s9  ;;  %1785 = vmatpush3.bf16.msra.mxu0 %v575_v57 }
 0x26a   : > { %1796 = vmatprep.subr.bf16.mxu0 %v2206_v0 }
 0x26e   : > { %1853 = vmatmul.mubr.msk.bf16.vlgmr.msra.gmra.mrb[28].mxu1 %vm512_vm3, %v1225_v58 }
 0x26f   : > { %1863 = vmatpush3.bf16.xpose.msra.mxu1 %v1351_v59  ;;  %1864 = vmatprep.mubr.msk.bf16.mxu1 %vm2207_vm0, %v2206_v0 }
 0x270   : > { %1874 = vmatprep.subr.bf16.mxu1 %v2206_v0 }
 0x276   : > { %1865 = vmatmul.mubr.msk.bf16.vlgmr.msra.gmra.mrb[32].mxu1 %vm512_vm3, %v1344_v60 }
 0x277   : > { %1878 = vmatprep.mubr.msk.bf16.mxu1 %vm2207_vm0, %v2206_v0 }
 0x2a4   : > { %v553_v61 = vpop.f32.mrb[4].mxu1 }
 0x2a5   : > { %v1782_v62 = vpop.f32.mrb[5].mxu1  ;;  %v560_v63 = vsel %vm559_vm5, %v553_v61, -inf }
 0x2a6   : > { %561 = vmax.xlane.f32.xlu0 %v560_v63  ;;  %v556_v1 = vpop.f32.mrb[6].mxu1 }
 0x2a7   : > { %v1783_v2 = vpop.f32.mrb[7].mxu1 }
 0x2da   : > { %v690_v18 = vpop.permute.xlu0 %689 }
 0x2db   : > { %v695_v33 = vsel %vm573_vm4, %v690_v18, 0  ;;  %v809_v45 = vpop.permute.xlu1 %808 }
 0x2dc   : > { %v814_v58 = vsel %vm573_vm4, %v809_v45, 0 }
 0x319   : > { %v670_v3 = vpop.f32.mrb[8].mxu1 }
 0x31a   : > { %v1794_v4 = vpop.f32.mrb[9].mxu1  ;;  %v676_v5 = vsel %vm559_vm5, %v670_v3, -inf }
 0x31b   : > { %677 = vmax.xlane.f32.xlu1 %v676_v5  ;;  %v673_v6 = vpop.f32.mrb[10].mxu1 }
 0x31c   : > { %v1795_v7 = vpop.f32.mrb[11].mxu1 }
 0x321   : > { %v792_v8 = vpop.f32.mrb[12].mxu1 }
 0x322   : > { %v1806_v9 = vpop.f32.mrb[13].mxu1  ;;  %v798_v10 = vsel %vm559_vm5, %v792_v8, -inf }
 0x323   : > { %799 = vmax.xlane.f32.xlu0 %v798_v10  ;;  %v795_v11 = vpop.f32.mrb[14].mxu1 }
 0x324   : > { %v1807_v12 = vpop.f32.mrb[15].mxu1 }
 0x329   : > { %v2555_v13 = vpop.f32.mrb[16].mxu1 }
 0x32a   : > { %v1818_v14 = vpop.f32.mrb[17].mxu1  ;;  %v917_v15 = vsel %vm559_vm5, %v2555_v13, -inf }
 0x32b   : > { %918 = vmax.xlane.f32.xlu0 %v917_v15  ;;  %v914_v16 = vpop.f32.mrb[18].mxu1 }
 0x32c   : > { %927 = vrot.lane.b32.xlu1 %v2533_v56, %s2212_s11  ;;  %v1819_v17 = vpop.f32.mrb[19].mxu1 }
 0x331   : > { %v2561_v19 = vpop.f32.mrb[20].mxu1 }
 0x332   : > { %v1830_v20 = vpop.f32.mrb[21].mxu1  ;;  %v1036_v41 = vsel %vm559_vm5, %v2561_v19, -inf }
 0x333   : > { %v562_v21 = vpop.xlane.xlu0 %561  ;;  %v1033_v22 = vpop.f32.mrb[22].mxu1 }
 0x334   : > { %v563_v23 = vsub.f32 %v553_v61, %v562_v21  ;;  %v1831_v24 = vpop.f32.mrb[23].mxu1 }
 0x336   : > { %v564_v25 = vmul.f32 1.442695, %v563_v23 }
 0x338   : > { %1995 = vpow2.f32 %v564_v25 }
 0x339   : > { %v2563_v26 = vpop.f32.mrb[24].mxu1 }
 0x33a   : > { %v1842_v27 = vpop.f32.mrb[25].mxu1  ;;  %v1155_v42 = vsel %vm559_vm5, %v2563_v26, -inf }
 0x33b   : > { %v1152_v28 = vpop.f32.mrb[26].mxu1 }
 0x33c   : > { %v1843_v29 = vpop.f32.mrb[27].mxu1 }
 0x341   : > { %1046 = vrot.lane.b32.xlu0 %v2533_v56, %s2213_s15  ;;  %v2567_v30 = vpop.f32.mrb[28].mxu1  ;;  %s1700_s15 = sshll.u32 %s2191_s21, 7  ;;  %s1531_s21 = scalar_lea.sflag [#allocation7], %s2440_s13 }
 0x342   : > { %v2569_v31 = vpop.eup %1995  ;;  %v1854_v32 = vpop.f32.mrb[29].mxu1  ;;  %v1274_v44 = vsel %vm559_vm5, %v2567_v30, -inf }
 0x343   : > { %v1271_v34 = vpop.f32.mrb[30].mxu1  ;;  %v569_v35 = vpack.c.bf16 %v2569_v31, %v2569_v31 }
 0x344   : > { %v1855_v36 = vpop.f32.mrb[31].mxu1 }
 0x345   : > { %1787 = vmatmul.mubr.msk.bf16.vlgmr.msra.gmra.mrb[8].mxu0 %vm559_vm5, %v569_v35  ;;  %v566_v36 = vsel %vm559_vm5, %v2569_v31, 0.0 }
 0x346   : > { %1797 = vmatpush3.bf16.msra.mxu0 %v695_v33  ;;  %1798 = vmatprep.mubr.msk.bf16.mxu0 %vm2207_vm0, %v2206_v0 }
 0x347   : > { %1808 = vmatprep.subr.bf16.mxu0 %v2206_v0 }
 0x349   : > { %v2578_v37 = vpop.f32.mrb[32].mxu1 }
 0x34a   : > { %v1866_v38 = vpop.f32.mrb[33].mxu1  ;;  %v1393_v43 = vsel %vm559_vm5, %v2578_v37, -inf }
 0x34b   : > { %v1390_v39 = vpop.f32.mrb[34].mxu1 }
 0x34c   : > { %v1867_v40 = vpop.f32.mrb[35].mxu1 }
 0x350   : > { %1037 = vmax.xlane.f32.xlu1 %v1036_v41 }
 0x354   : > { %1156 = vmax.xlane.f32.xlu1 %v1155_v42 }
 0x358   : > { %1394 = vmax.xlane.f32.xlu1 %v1393_v43 }
 0x360   : > { %1275 = vmax.xlane.f32.xlu0 %v1274_v44 }
 0x369   : > { %1165 = vrot.lane.b32.xlu1 %v2533_v56, %s2214_s27  ;;  %s282_s27 = scalar_lea.vmem [#allocation11], %s1657_s7 }
 0x376   : > { %1284 = vrot.lane.b32.xlu0 %v2533_v56, %s2215_s14  ;;  %s1545_s14 = sshll.u32 %s282_s27, 4  ;;  %s2650_s14 = int_to_ptr.vmem [resolvable:$true] %s1545_s14 }
 0x37a   : > { %1403 = vrot.lane.b32.xlu0 %v2533_v56, %s2216_s10 }
 0x3a8   : > { %v678_v46 = vpop.xlane.xlu1 %677 }
 0x3a9   : > { %v679_v47 = vsub.f32 %v670_v3, %v678_v46 }
 0x3ab   : > { %v680_v48 = vmul.f32 1.442695, %v679_v47 }
 0x3ac   : > { %v928_v60 = vpop.permute.xlu1 %927 }
 0x3ad   : > { %1997 = vpow2.f32 %v680_v48  ;;  %v933_v63 = vsel %vm573_vm4, %v928_v60, 0 }
 0x3b0   : > { %v800_v49 = vpop.xlane.xlu0 %799 }
 0x3b1   : > { %v801_v50 = vsub.f32 %v792_v8, %v800_v49 }
 0x3b3   : > { %v802_v51 = vmul.f32 1.442695, %v801_v50 }
 0x3b5   : > { %1999 = vpow2.f32 %v802_v51 }
 0x3b7   : > { %v1998_v52 = vpop.eup %1997 }
 0x3b8   : > { %v919_v53 = vpop.xlane.xlu0 %918  ;;  %v682_v54 = vsel %vm559_vm5, %v1998_v52, 0.0  ;;  %v685_v55 = vpack.c.bf16 %v1998_v52, %v1998_v52 }
 0x3b9   : > { %v920_v57 = vsub.f32 %v2555_v13, %v919_v53  ;;  %683 = vadd.xlane.f32.xlu1 %v682_v54 }
 0x3ba   : > { %1799 = vmatmul.mubr.msk.bf16.vlgmr.msra.gmra.mrb[12].mxu0 %vm559_vm5, %v685_v55 }
 0x3bb   : > { %v921_v56 = vmul.f32 1.442695, %v920_v57  ;;  %1809 = vmatpush3.bf16.msra.mxu0 %v814_v58  ;;  %1810 = vmatprep.mubr.msk.bf16.mxu0 %vm2207_vm0, %v2206_v0 }
 0x3bc   : > { %1820 = vmatprep.subr.bf16.mxu0 %v2206_v0  ;;  %v1047_v2 = vpop.permute.xlu0 %1046 }
 0x3bd   : > { %2001 = vpow2.f32 %v921_v56  ;;  %v1052_v5 = vsel %vm573_vm4, %v1047_v2, 0 }
 0x3bf   : > { %v2000_v59 = vpop.eup %1999 }
 0x3c0   : > { %v804_v61 = vsel %vm559_vm5, %v2000_v59, 0.0  ;;  %v807_v62 = vpack.c.bf16 %v2000_v59, %v2000_v59 }
 0x3c1   : > { %805 = vadd.xlane.f32.xlu0 %v804_v61 }
 0x3c2   : > { %1811 = vmatmul.mubr.msk.bf16.vlgmr.msra.gmra.mrb[16].mxu0 %vm559_vm5, %v807_v62 }
 0x3c3   : > { %1821 = vmatpush3.bf16.msra.mxu0 %v933_v63  ;;  %1822 = vmatprep.mubr.msk.bf16.mxu0 %vm2207_vm0, %v2206_v0 }
 0x3c4   : > { %1832 = vmatprep.subr.bf16.mxu0 %v2206_v0 }
 0x3c7   : > { %v2002_v1 = vpop.eup %2001 }
 0x3c8   : > { %v923_v3 = vsel %vm559_vm5, %v2002_v1, 0.0  ;;  %v926_v4 = vpack.c.bf16 %v2002_v1, %v2002_v1 }
 0x3c9   : > { %924 = vadd.xlane.f32.xlu0 %v923_v3 }
 0x3ca   : > { %1823 = vmatmul.mubr.msk.bf16.vlgmr.msra.gmra.mrb[20].mxu0 %vm559_vm5, %v926_v4 }
 0x3cb   : > { %1833 = vmatpush3.bf16.msra.mxu0 %v1052_v5  ;;  %1834 = vmatprep.mubr.msk.bf16.mxu0 %vm2207_vm0, %v2206_v0 }
 0x3cc   : > { %1844 = vmatprep.subr.bf16.mxu0 %v2206_v0 }
 0x3dd   : > { %v1038_v6 = vpop.xlane.xlu1 %1037 }
 0x3de   : > { %v1039_v7 = vsub.f32 %v2561_v19, %v1038_v6 }
 0x3e0   : > { %v1040_v8 = vmul.f32 1.442695, %v1039_v7 }
 0x3e1   : > { %v1157_v9 = vpop.xlane.xlu1 %1156 }
 0x3e2   : > { %2003 = vpow2.f32 %v1040_v8  ;;  %v1158_v10 = vsub.f32 %v2563_v26, %v1157_v9 }
 0x3e4   : > { %v1159_v11 = vmul.f32 1.442695, %v1158_v10 }
 0x3e5   : > { %v1395_v12 = vpop.xlane.xlu1 %1394 }
 0x3e6   : > { %2005 = vpow2.f32 %v1159_v11  ;;  %v1396_v13 = vsub.f32 %v2578_v37, %v1395_v12 }
 0x3e8   : > { %v1397_v14 = vmul.f32 1.442695, %v1396_v13 }
 0x3e9   : > { %v1166_v16 = vpop.permute.xlu1 %1165 }
 0x3ea   : > { %2007 = vpow2.f32 %v1397_v14  ;;  %v1171_v21 = vsel %vm573_vm4, %v1166_v16, 0 }
 0x3ec   : > { %v2004_v15 = vpop.eup %2003 }
 0x3ed   : > { %v1276_v17 = vpop.xlane.xlu0 %1275  ;;  %v1042_v18 = vsel %vm559_vm5, %v2004_v15, 0.0  ;;  %v1045_v20 = vpack.c.bf16 %v2004_v15, %v2004_v15 }
 0x3ee   : > { %v1277_v19 = vsub.f32 %v2567_v30, %v1276_v17  ;;  %1043 = vadd.xlane.f32.xlu1 %v1042_v18 }
 0x3ef   : > { %1835 = vmatmul.mubr.msk.bf16.vlgmr.msra.gmra.mrb[24].mxu0 %vm559_vm5, %v1045_v20 }
 0x3f0   : > { %v2006_v22 = vpop.eup %2005  ;;  %v1278_v23 = vmul.f32 1.442695, %v1277_v19  ;;  %1845 = vmatpush3.bf16.msra.mxu0 %v1171_v21  ;;  %1846 = vmatprep.mubr.msk.bf16.mxu0 %vm2207_vm0, %v2206_v0 }
 0x3f1   : > { %v1161_v24 = vsel %vm559_vm5, %v2006_v22, 0.0  ;;  %1856 = vmatprep.subr.bf16.mxu0 %v2206_v0  ;;  %v1285_v26 = vpop.permute.xlu0 %1284  ;;  %v1164_v28 = vpack.c.bf16 %v2006_v22, %v2006_v22 }
 0x3f2   : > { %2009 = vpow2.f32 %v1278_v23  ;;  %1162 = vadd.xlane.f32.xlu0 %v1161_v24  ;;  %v1290_v29 = vsel %vm573_vm4, %v1285_v26, 0  ;;  %v1993_v26 = vld [vmem:[#allocation10] sm:$0xff]  }
 0x3f3   : > { %1875 = vmatpush3.bf16.msra.mxu1 %v1993_v26 }
 0x3f4   : > { %v2008_v25 = vpop.eup %2007  ;;  %1876 = vmatprep.subr.bf16.mxu1 %v2206_v0 }
 0x3f5   : > { %v1399_v27 = vsel %vm559_vm5, %v2008_v25, 0.0  ;;  %v1404_v32 = vpop.permute.xlu0 %1403  ;;  %v1402_v37 = vpack.c.bf16 %v2008_v25, %v2008_v25 }
 0x3f6   : > { %1400 = vadd.xlane.f32.xlu0 %v1399_v27  ;;  %v1409_v35 = vsel %vm573_vm4, %v1404_v32, 0 }
 0x3f7   : > { %1847 = vmatmul.mubr.msk.bf16.vlgmr.msra.gmra.mrb[28].mxu0 %vm559_vm5, %v1164_v28 }
 0x3f8   : > { %1857 = vmatpush3.bf16.msra.mxu0 %v1290_v29  ;;  %1858 = vmatprep.mubr.msk.bf16.mxu0 %vm2207_vm0, %v2206_v0 }
 0x3f9   : > { %1868 = vmatprep.subr.bf16.mxu0 %v2206_v0 }
 0x3fc   : > { %v2010_v30 = vpop.eup %2009 }
 0x3fd   : > { %v1280_v33 = vsel %vm559_vm5, %v2010_v30, 0.0  ;;  %v1283_v34 = vpack.c.bf16 %v2010_v30, %v2010_v30  ;;  %v1994_v30 = vld [vmem:[#allocation10 + $0x8] sm:$0xff]  }
 0x3fe   : > { %1281 = vadd.xlane.f32.xlu1 %v1280_v33  ;;  %1877 = vmatpush3.bf16.msra.mxu1 %v1994_v30 }
 0x3ff   : > { %1859 = vmatmul.mubr.msk.bf16.vlgmr.msra.gmra.mrb[32].mxu0 %vm559_vm5, %v1283_v34 }
 0x400   : > { %1869 = vmatpush3.bf16.msra.mxu0 %v1409_v35  ;;  %1870 = vmatprep.mubr.msk.bf16.mxu0 %vm2207_vm0, %v2206_v0 }
 0x402   : > { %567 = vadd.xlane.f32.xlu1 %v566_v36 }
 0x407   : > { %1871 = vmatmul.mubr.msk.bf16.vlgmr.msra.gmra.mrb[36].mxu0 %vm559_vm5, %v1402_v37 }
 0x418   : > { %v611_v38 = vpop.f32.mrb[8].mxu0 }
 0x419   : > { %v1788_v39 = vpop.f32.mrb[9].mxu0 }
 0x41a   : > { %v614_v40 = vpop.f32.mrb[10].mxu0 }
 0x41b   : > { %v1789_v41 = vpop.f32.mrb[11].mxu0 }
 0x446   : > { %v684_v42 = vpop.xlane.xlu1 %683 }
 0x447   : > { %2011 = vrcp.f32 %v684_v42 }
 0x44e   : > { %v806_v44 = vpop.xlane.xlu0 %805 }
 0x44f   : > { %2013 = vrcp.f32 %v806_v44 }
 0x451   : > { %v2012_v46 = vpop.eup %2011 }
 0x456   : > { %v925_v51 = vpop.xlane.xlu0 %924 }
 0x459   : > { %v2014_v54 = vpop.eup %2013 }
 0x47b   : > { %v1044_v43 = vpop.xlane.xlu1 %1043 }
 0x47f   : > { %v1163_v8 = vpop.xlane.xlu0 %1162 }
 0x483   : > { %v1401_v21 = vpop.xlane.xlu0 %1400 }
 0x48b   : > { %v1282_v45 = vpop.xlane.xlu1 %1281 }
 0x48d   : > { %v731_v47 = vpop.f32.mrb[12].mxu0 }
 0x48e   : > { %v738_v48 = vmul.f32 %v2012_v46, %v731_v47  ;;  %v1800_v49 = vpop.f32.mrb[13].mxu0 }
 0x48f   : > { %v568_v50 = vpop.xlane.xlu1 %567  ;;  %v734_v31 = vpop.f32.mrb[14].mxu0 }
 0x490   : > { %v1703_v52 = vpack.c.bf16 %v738_v48, %v738_v48  ;;  %2015 = vrcp.f32 %v568_v50  ;;  %v1801_v53 = vpop.f32.mrb[15].mxu0  ;;  %v1695_v48 = vld [vmem:[%s2702_s4] ss:$0 sm:$0xff] }
 0x491   : > { %2017 = vrcp.f32 %v925_v51 }
 0x492   : > { %743 = vrot.lane.b32.xlu0 %v1703_v52, %s2217_s25  ;;  %2019 = vrcp.f32 %v1044_v43 }
 0x493   : > { %2021 = vrcp.f32 %v1163_v8 }
 0x494   : > { %2023 = vrcp.f32 %v1282_v45 }
 0x495   : > { %v850_v55 = vpop.f32.mrb[16].mxu0  ;;  %2025 = vrcp.f32 %v1401_v21 }
 0x496   : > { %v857_v57 = vmul.f32 %v2014_v54, %v850_v55  ;;  %v1812_v58 = vpop.f32.mrb[17].mxu0 }
 0x497   : > { %v853_v56 = vpop.f32.mrb[18].mxu0 }
 0x498   : > { %v1704_v59 = vpack.c.bf16 %v857_v57, %v857_v57  ;;  %v1813_v60 = vpop.f32.mrb[19].mxu0 }
 0x49a   : > { %v2016_v61 = vpop.eup %2015  ;;  %862 = vrot.lane.b32.xlu1 %v1704_v59, %s2218_s16  ;;  %s2648_s16 = scalar_lea.hbm %s2703_s5, %s1700_s15 }
 0x49b   : > { %v618_v62 = vmul.f32 %v2016_v61, %v611_v38  ;;  %v2018_v63 = vpop.eup %2017 }
 0x49c   : > { %v2020_v9 = vpop.eup %2019 }
 0x49d   : > { %v969_v1 = vpop.f32.mrb[20].mxu0  ;;  %v619_v2 = vpack.c.bf16 %v618_v62, %v618_v62  ;;  %v2022_v16 = vpop.eup %2021 }
 0x49e   : > { %v976_v3 = vmul.f32 %v2018_v63, %v969_v1  ;;  %v1824_v4 = vpop.f32.mrb[21].mxu0  ;;  %v2024_v24 = vpop.eup %2023 }
 0x49f   : > { %v972_v5 = vpop.f32.mrb[22].mxu0  ;;  %621 = vst.msk [vmem:[#allocation4] sm:$0xf] %vm620_vm6, %v619_v2  ;;  %v2026_v34 = vpop.eup %2025 }
 0x4a0   : > { %v1705_v6 = vpack.c.bf16 %v976_v3, %v976_v3  ;;  %v1825_v7 = vpop.f32.mrb[23].mxu0 }
 0x4a2   : > { %981 = vrot.lane.b32.xlu1 %v1705_v6, %s2219_s17  ;;  %s2113_s17 = scalar_lea.vmem %s2650_s14, 128 }
 0x4a3   : > { %p2114_p8 = scmp.ne.s32.totalorder %s2650_s14, %s2113_s17 }
 0x4a5   : > { %p2115_p1 = pnand %p2114_p8, %p2718_p12 }
 0x4a7   : > { %p2116_p10 = pneg %p2115_p1 }
 0x4c2   : > { %v1088_v10 = vpop.f32.mrb[24].mxu0 }
 0x4c3   : > { %v1095_v11 = vmul.f32 %v2020_v9, %v1088_v10  ;;  %v1836_v12 = vpop.f32.mrb[25].mxu0 }
 0x4c4   : > { %v1091_v13 = vpop.f32.mrb[26].mxu0 }
 0x4c5   : > { %v1706_v14 = vpack.c.bf16 %v1095_v11, %v1095_v11  ;;  %v1837_v15 = vpop.f32.mrb[27].mxu0 }
 0x4c7   : > { %1100 = vrot.lane.b32.xlu0 %v1706_v14, %s2220_s28  ;;  %s2224_s28 = smov [#allocation11]  }
 0x4ca   : > { %v1207_v17 = vpop.f32.mrb[28].mxu0 }
 0x4cb   : > { %v1214_v18 = vmul.f32 %v2022_v16, %v1207_v17  ;;  %v1848_v20 = vpop.f32.mrb[29].mxu0 }
 0x4cc   : > { %v1210_v19 = vpop.f32.mrb[30].mxu0 }
 0x4cd   : > { %v1707_v22 = vpack.c.bf16 %v1214_v18, %v1214_v18  ;;  %v1849_v23 = vpop.f32.mrb[31].mxu0 }
 0x4cf   : > { %1219 = vrot.lane.b32.xlu1 %v1707_v22, %s2221_s30  ;;  %s2117_s30 = sshll.u32 %s2224_s28, 4  ;;  %s2118_s30 = int_to_ptr.vmem [resolvable:$false] %s2117_s30 }
 0x4d0   : > { %p2120_p3 = scmp.lt.s32.totalorder %s2650_s14, %s2118_s30 }
 0x4d2   : > { %v1326_v25 = vpop.f32.mrb[32].mxu0 }
 0x4d3   : > { %v1333_v27 = vmul.f32 %v2024_v24, %v1326_v25  ;;  %v1860_v28 = vpop.f32.mrb[33].mxu0 }
 0x4d4   : > { %v1329_v29 = vpop.f32.mrb[34].mxu0 }
 0x4d5   : > { %v1708_v32 = vpack.c.bf16 %v1333_v27, %v1333_v27  ;;  %v1861_v33 = vpop.f32.mrb[35].mxu0 }
 0x4d7   : > { %1338 = vrot.lane.b32.xlu0 %v1708_v32, %s2222_s26  ;;  %s2119_s26 = scalar_lea.vmem %s2118_s30, 256 }
 0x4d8   : > { %p2121_p5 = scmp.lt.s32.totalorder %s2119_s26, %s2113_s17 }
 0x4da   : > { %v1445_v35 = vpop.f32.mrb[36].mxu0  ;;  %p2122_p9 = por %p2121_p5, %p2120_p3 }
 0x4db   : > { %v1452_v36 = vmul.f32 %v2026_v34, %v1445_v35  ;;  %v1872_v37 = vpop.f32.mrb[37].mxu0 }
 0x4dc   : > { %v1448_v38 = vpop.f32.mrb[38].mxu0  ;;  %p2123_p11 = pnand %p2122_p9, %p2116_p10 }
 0x4dd   : > { %v1709_v39 = vpack.c.bf16 %v1452_v36, %v1452_v36  ;;  %v1873_v40 = vpop.f32.mrb[39].mxu0 }
 0x4df   : > { %1457 = vrot.lane.b32.xlu1 %v1709_v39, %s2223_s24 }
 0x504   : > { %v744_v41 = vpop.permute.xlu0 %743 }
 0x505   : > { %747 = vst.msk [vmem:[#allocation4] sm:$0xf] %vm746_vm7, %v744_v41 }
 0x50c   : > { %v863_v42 = vpop.permute.xlu1 %862 }
 0x50d   : > { %866 = vst.msk [vmem:[#allocation4] sm:$0xf] %vm865_vm8, %v863_v42 }
 0x514   : > { %v982_v0 = vpop.permute.xlu1 %981 }
 0x515   : > { %985 = vst.msk [vmem:[#allocation4] sm:$0xf] %vm984_vm9, %v982_v0 }
 0x539   : > { %v1101_v43 = vpop.permute.xlu0 %1100 }
 0x53a   : > { %1104 = vst.msk [vmem:[#allocation4] sm:$0xf] %vm1103_vm10, %v1101_v43 }
 0x541   : > { %v1220_v44 = vpop.permute.xlu1 %1219 }
 0x542   : > { %1223 = vst.msk [vmem:[#allocation4] sm:$0xf] %vm1222_vm11, %v1220_v44 }
 0x549   : > { %v1339_v45 = vpop.permute.xlu0 %1338 }
 0x54a   : > { %1342 = vst.msk [vmem:[#allocation4] sm:$0xf] %vm1341_vm12, %v1339_v45 }
 0x551   : > { %v1458_v46 = vpop.permute.xlu1 %1457 }
 0x552   : > { %1461 = vst.msk [vmem:[#allocation4] sm:$0xf] %vm1460_vm13, %v1458_v46 }
 0x559   : > { %v1462_v47 = vld [vmem:[#allocation4] sm:$0xf] }
 0x55a   : > { %1879 = vmatmul.mubr.msk.bf16.vlgmr.msra.gmra.mrb[36].mxu1 %vm318_vm1, %v1462_v47 }
 0x62d   : > { %v1523_v49 = vpop.f32.mrb[36].mxu1 }
 0x62e   : > { %v1524_v50 = vadd.f32 %v1695_v48, %v1523_v49  ;;  %v1880_v31 = vpop.f32.mrb[37].mxu1 }
 0x62f   : > { %v1526_v51 = vpop.f32.mrb[38].mxu1 }
 0x630   : > { %v1881_v52 = vpop.f32.mrb[39].mxu1  ;;  %1529 = vst.msk [vmem:[%s282_s27] sm:$0xff] %vm318_vm1, %v1524_v50 }
 0x631   : > { %2126 = shalt.err (!%p2123_p11)
}
 0x632   : > { %s2127_s13 = scalar_lea.hbm %s2648_s16, 128  ;;  %s2131_s9 = scalar_lea.hbm %s2703_s5, 256 }
 0x633   : > { %p2128_p0 = scmp.ne.s32.totalorder %s2648_s16, %s2127_s13  ;;  %p2132_p6 = scmp.lt.u32.totalorder %s2648_s16, %s2703_s5 }
 0x634   : > { %p2133_p7 = scmp.lt.u32.totalorder %s2131_s9, %s2127_s13  ;;  %p2135_p8 = scmp.lt.u32.totalorder %s2127_s13, %s2648_s16 }
 0x635   : > { %p2129_p4 = pnand %p2128_p0, %p2718_p12 }
 0x636   : > { %p2134_p2 = por %p2133_p7, %p2132_p6 }
 0x637   : > { %p2130_p13 = pneg %p2129_p4 }
 0x638   : > { %p2136_p1 = por %p2135_p8, %p2134_p2 }
 0x63a   : > { %p2137_p10 = pnand %p2136_p1, %p2130_p13 }
 0x63c   : > { %2140 = shalt.err (!%p2137_p10)
}
 0x63d   : > { %1892 = dma.vmem_to_hbm [thread:$0]  (%p2718_p12), %s2650_s14, 128, %s2648_s16, %s1531_s21  }
 0x63e PF: > { %s1557_s27 = sand.u32 1, %s2179_s18   ;;  %p2719_p3 = scmp.ne.s32.totalorder %s2711_s29, 0 }
 0x63f   : > { %p2720_p5 = scmp.ge.s32.totalorder %s2199_s23, 2  ;;  %s1558_s10 = scalar_lea.sflag [#allocation7], %s1557_s27 }
 0x641   : > { %p1906_p9 = pnand %p2720_p5, %p2719_p3 }
 0x643   : > { %2174 = dma.done.wait (!%p1906_p9), %s1558_s10, 128  }
 0x644   : > { %2176 = vsyncadd (!%p1906_p9), %s1558_s10, 4294967168  ;;  %s22_s23 = sadd.s32 1, %s2199_s23   ;;  %s2721_s18 = smov %s2183_s19 }
 0x645   : > { %p19_p11 = scmp.ge.s32.totalorder %s22_s23, 4   ;;  %s2722_s19 = smov %s2187_s20 }
 0x646   : > { %s2723_s20 = smov %s2397_s6  ;;  %s2724_s21 = smov %s2195_s22 }
 0x647   : > { %s2725_s22 = smov %s2727_s12  ;;  %21 = sbr.rel (!%p19_p11) target bundleno = 7 (0x7), region = 98 }
 0x64e   :  { %1563 = vsyncpa [#allocation6], 1 }
 0x64f   :  { %1565 = vsyncpa [#allocation6 + $0x1], 1 }
 0x650   :  { %1566 = vsyncpa [#allocation9], 1 }
 0x651   :  { %1567 = vsyncpa [#allocation7], 1 }
 0x652   :  { %1569 = vsyncpa [#allocation7 + $0x1], 1 }

</bundles_post_ra>
